<compile_context>
chip_gen: v6e
topology: v6e:2x2x1
jax: 0.10.0
libtpu: 0.0.40
codegen_flags: <defaults>
</compile_context>

<pallas_src>
import functools

import jax
import jax.numpy as jnp
from jax.experimental import pallas as pl
from jax.experimental.pallas import tpu as pltpu


# ----------------------------------------------------------------------------
# LSTM cell (full-width activations + lane select)
# ----------------------------------------------------------------------------
def _lstm_cell(gates, c_prev, g_mask, H):
    """One LSTM cell update from a pre-summed gate slab (Bp, 4H).

    PyTorch gate order: i, f, g, o.  Activations are computed on the whole
    (Bp, 4H) slab (one sigmoid pass + one tanh pass + one select) rather than
    four sub-vreg passes; each lane ends up with exactly the same function of
    the same pre-activation as the reference.
    """
    act = jnp.where(g_mask, jnp.tanh(gates), jax.nn.sigmoid(gates))
    i_g = act[:, 0 * H:1 * H]
    f_g = act[:, 1 * H:2 * H]
    g_g = act[:, 2 * H:3 * H]
    o_g = act[:, 3 * H:4 * H]
    c_new = f_g * c_prev + i_g * g_g
    h_new = o_g * jnp.tanh(c_new)
    return h_new, c_new


# ----------------------------------------------------------------------------
# Fused kernel: input proj + all LSTM layers + ReLU + FC, one invocation
# ----------------------------------------------------------------------------
def _fused_lstm_fc_kernel(*refs, num_layers, T, Bp, H):
    """refs layout:
      inputs : x_flat (T*Bp, C), then (w_ih, b, w_hh) per layer, then w_fc, b_fc
      outputs: out (Bp, out_c)
      scratch: gx (T*Bp, 4H), hseq (T*Bp, H), h (Bp, H), c (Bp, H)
    """
    x_ref = refs[0]
    layer_refs = refs[1:1 + 3 * num_layers]
    (w_fc_ref, b_fc_ref, out_ref,
     gx_scr, hseq_scr, h_scr, c_scr) = refs[1 + 3 * num_layers:]

    # Lane mask selecting the `g` (cell candidate) quarter of the gate slab.
    # Built once (JAX does not CSE broadcasts).
    lane = jax.lax.broadcasted_iota(jnp.int32, (Bp, 4 * H), 1)
    g_mask = (lane >= 2 * H) & (lane < 3 * H)

    for l in range(num_layers):
        w_ih_ref = layer_refs[3 * l + 0]
        b_ref = layer_refs[3 * l + 1]
        w_hh_ref = layer_refs[3 * l + 2]
        last = (l == num_layers - 1)

        # Time-parallel input projection for the whole sequence: one MXU matmul
        # (T*Bp rows) off the serial recurrence path.  Layers > 0 read the
        # previous layer's hidden sequence straight from VMEM scratch -- no HBM
        # round trip between layers.
        src_ref = x_ref if l == 0 else hseq_scr
        gx_scr[...] = (
            jnp.dot(src_ref[...], w_ih_ref[...],
                    preferred_element_type=jnp.float32)
            + b_ref[...]
        )

        h_scr[...] = jnp.zeros_like(h_scr)
        c_scr[...] = jnp.zeros_like(c_scr)
        whh = w_hh_ref[...]           # hoisted: constant across timesteps

        # Fully unrolled: T is small here; all slice offsets are static and
        # multiples of 8 sublanes (Bp == 8k), so no masked loads/stores.
        for s in range(T):
            gates = (
                gx_scr[pl.ds(s * Bp, Bp), :]
                + jnp.dot(h_scr[...], whh, preferred_element_type=jnp.float32)
            )
            h_new, c_new = _lstm_cell(gates, c_scr[...], g_mask, H)
            h_scr[...] = h_new
            c_scr[...] = c_new
            if not last:
                hseq_scr[pl.ds(s * Bp, Bp), :] = h_new

    # ReLU + Linear epilogue on the final hidden state only; one full-slab
    # (Bp, out_c) store.
    h_last = jnp.maximum(h_scr[...], 0.0)
    out_ref[...] = (
        jnp.dot(h_last, w_fc_ref[...], preferred_element_type=jnp.float32)
        + b_fc_ref[...]
    )


# ----------------------------------------------------------------------------
# Wrapper
# ----------------------------------------------------------------------------
@jax.jit
def lstm_net_forward(x, params):
    """Forward pass of LSTMNet.  x: (B, T, in_channels), batch_first."""
    B, T, C = x.shape
    layers = params["lstm_layers"]
    H = layers[0]["w_hh"].shape[0]
    out_c = params["w_fc"].shape[1]

    # Pad batch to a full 8-row f32 sublane tile; t-major flat layout so every
    # per-timestep block is an aligned (Bp, 4H) tile.  Padded rows are
    # independent (LSTM is row-wise) and are dropped after the kernel.
    Bp = ((B + 7) // 8) * 8
    x_tm = jnp.transpose(x, (1, 0, 2))                       # (T, B, C)
    x_tm = jnp.pad(x_tm, ((0, 0), (0, Bp - B), (0, 0)))      # (T, Bp, C)
    x_flat = x_tm.reshape(T * Bp, C)

    flat_args = [x_flat]
    for layer in layers:
        flat_args += [layer["w_ih"], layer["b"], layer["w_hh"]]
    flat_args += [params["w_fc"], params["b_fc"]]

    kernel = functools.partial(
        _fused_lstm_fc_kernel, num_layers=len(layers), T=T, Bp=Bp, H=H)

    out_padded = pl.pallas_call(
        kernel,
        out_shape=jax.ShapeDtypeStruct((Bp, out_c), jnp.float32),
        scratch_shapes=[
            pltpu.VMEM((T * Bp, 4 * H), jnp.float32),  # gate slab (reused per layer)
            pltpu.VMEM((T * Bp, H), jnp.float32),      # inter-layer hidden sequence
            pltpu.VMEM((Bp, H), jnp.float32),          # h state
            pltpu.VMEM((Bp, H), jnp.float32),          # c state
        ],
    )(*flat_args)

    # out[:, -1, :].squeeze() then fc(relu(.)); squeeze is a no-op for B > 1.
    # TODO(synk): PyTorch .squeeze() would drop the batch dim when B == 1.
    return out_padded[:B, :]


# ----------------------------------------------------------------------------
# Deterministic parameter construction (shapes follow nn.LSTM / nn.Linear)
# ----------------------------------------------------------------------------
def init_params(key, in_channels, hid_channels, out_channels, num_layers):
    H = hid_channels
    bound = 1.0 / jnp.sqrt(jnp.float32(H))
    layers = []
    for l in range(num_layers):
        in_sz = in_channels if l == 0 else H
        key, k1, k2, k3, k4 = jax.random.split(key, 5)
        # PyTorch: weight_ih (4H, in), weight_hh (4H, H); stored transposed.
        w_ih = jax.random.uniform(k1, (4 * H, in_sz), jnp.float32, -bound, bound).T
        w_hh = jax.random.uniform(k2, (4 * H, H), jnp.float32, -bound, bound).T
        b_ih = jax.random.uniform(k3, (4 * H,), jnp.float32, -bound, bound)
        b_hh = jax.random.uniform(k4, (4 * H,), jnp.float32, -bound, bound)
        layers.append({
            "w_ih": jnp.asarray(w_ih),
            "w_hh": jnp.asarray(w_hh),
            "b": (b_ih + b_hh).reshape(1, 4 * H),
        })
    key, kf1, kf2 = jax.random.split(key, 3)
    fbound = 1.0 / jnp.sqrt(jnp.float32(H))
    w_fc = jax.random.uniform(kf1, (out_channels, H), jnp.float32, -fbound, fbound).T
    b_fc = jax.random.uniform(kf2, (out_channels,), jnp.float32, -fbound, fbound)
    return {
        "lstm_layers": layers,
        "w_fc": jnp.asarray(w_fc),
        "b_fc": b_fc.reshape(1, out_channels),
    }


# ----------------------------------------------------------------------------
# Pure-JAX reference (sanity check)
# ----------------------------------------------------------------------------
def reference_forward(x, params):
    h_seq = jnp.transpose(x, (1, 0, 2))  # (T, B, C)
    for layer in params["lstm_layers"]:
        H = layer["w_hh"].shape[0]
        B = h_seq.shape[1]

        def step(carry, x_t, layer=layer, H=H):
            h, c = carry
            gates = x_t @ layer["w_ih"] + h @ layer["w_hh"] + layer["b"]
            i = jax.nn.sigmoid(gates[:, 0 * H:1 * H])
            f = jax.nn.sigmoid(gates[:, 1 * H:2 * H])
            g = jnp.tanh(gates[:, 2 * H:3 * H])
            o = jax.nn.sigmoid(gates[:, 3 * H:4 * H])
            c = f * c + i * g
            h = o * jnp.tanh(c)
            return (h, c), h

        init = (jnp.zeros((B, H), jnp.float32), jnp.zeros((B, H), jnp.float32))
        _, h_seq = jax.lax.scan(step, init, h_seq)
    h_last = h_seq[-1]
    return jnp.maximum(h_last, 0.0) @ params["w_fc"] + params["b_fc"]


# ----------------------------------------------------------------------------
if __name__ == "__main__":
    B, T = 2, 8
    in_channels, hid_channels, out_channels, num_layers = 4, 32, 8, 2

    key = jax.random.PRNGKey(0)
    key, kx, kp = jax.random.split(key, 3)
    x = jax.random.normal(kx, (B, T, in_channels), dtype=jnp.float32)
    params = init_params(kp, in_channels, hid_channels, out_channels, num_layers)

    out = lstm_net_forward(x, params)
    out = jax.block_until_ready(out)

    ref = reference_forward(x, params)
    assert out.shape == (B, out_channels)
    assert jnp.allclose(out, ref, atol=1e-4, rtol=1e-4)

    print("KERNEL_OK")
</pallas_src>

<mosaic_0001>
module attributes {stable_mosaic.version = 11 : i64} {
  func.func @_fused_lstm_fc_kernel(%arg0: memref<64x4xf32, #tpu.memory_space<vmem>>, %arg1: memref<4x128xf32, #tpu.memory_space<vmem>>, %arg2: memref<1x128xf32, #tpu.memory_space<vmem>>, %arg3: memref<32x128xf32, #tpu.memory_space<vmem>>, %arg4: memref<32x128xf32, #tpu.memory_space<vmem>>, %arg5: memref<1x128xf32, #tpu.memory_space<vmem>>, %arg6: memref<32x128xf32, #tpu.memory_space<vmem>>, %arg7: memref<32x8xf32, #tpu.memory_space<vmem>>, %arg8: memref<1x8xf32, #tpu.memory_space<vmem>>, %arg9: memref<8x8xf32, #tpu.memory_space<vmem>>, %arg10: memref<64x128xf32, #tpu.memory_space<vmem>>, %arg11: memref<64x32xf32, #tpu.memory_space<vmem>>, %arg12: memref<8x32xf32, #tpu.memory_space<vmem>>, %arg13: memref<8x32xf32, #tpu.memory_space<vmem>>) attributes {dimension_semantics = [], scalar_prefetch = 0 : i64, scratch_operands = 4 : i64, tpu.core_type = #tpu.core_type<tc>} {
    %0 = tpu.iota {dimensions = array<i32: 1>} : vector<8x128xi32>
    %c64_i32 = arith.constant 64 : i32
    %1 = vector.broadcast %c64_i32 : i32 to vector<8x128xi32>
    %2 = arith.cmpi sge, %0, %1 : vector<8x128xi32>
    %c96_i32 = arith.constant 96 : i32
    %3 = vector.broadcast %c96_i32 : i32 to vector<8x128xi32>
    %4 = arith.cmpi slt, %0, %3 : vector<8x128xi32>
    %5 = arith.andi %2, %4 : vector<8x128xi1>
    %c0 = arith.constant 0 : index
    %c0_0 = arith.constant 0 : index
    %6 = vector.load %arg0[%c0, %c0_0] : memref<64x4xf32, #tpu.memory_space<vmem>>, vector<64x4xf32>
    %c0_1 = arith.constant 0 : index
    %c0_2 = arith.constant 0 : index
    %7 = vector.load %arg1[%c0_1, %c0_2] : memref<4x128xf32, #tpu.memory_space<vmem>>, vector<4x128xf32>
    %cst = arith.constant dense<0.000000e+00> : vector<64x128xf32>
    %8 = tpu.matmul %6, %7, %cst {dimension_numbers = #tpu.dot_dimension_numbers<[1], [0], [0], [1], [0, 0, 1, 1], [], []>} : vector<64x4xf32>, vector<4x128xf32>, vector<64x128xf32> -> vector<64x128xf32>
    %c0_3 = arith.constant 0 : index
    %c0_4 = arith.constant 0 : index
    %9 = vector.load %arg2[%c0_3, %c0_4] : memref<1x128xf32, #tpu.memory_space<vmem>>, vector<1x128xf32>
    %10 = vector.broadcast %9 : vector<1x128xf32> to vector<64x128xf32>
    %11 = arith.addf %8, %10 : vector<64x128xf32>
    %c0_5 = arith.constant 0 : index
    %c0_6 = arith.constant 0 : index
    %12 = vector.load %arg10[%c0_5, %c0_6] : memref<64x128xf32, #tpu.memory_space<vmem>>, vector<64x128xf32>
    tpu.vector_store %arg10[%c0_5, %c0_6], %11 {strides = array<i32>} : memref<64x128xf32, #tpu.memory_space<vmem>>, vector<64x128xf32>,
    %cst_7 = arith.constant 0.000000e+00 : f32
    %13 = vector.broadcast %cst_7 : f32 to vector<8x32xf32>
    %c0_8 = arith.constant 0 : index
    %c0_9 = arith.constant 0 : index
    %14 = vector.load %arg12[%c0_8, %c0_9] : memref<8x32xf32, #tpu.memory_space<vmem>>, vector<8x32xf32>
    tpu.vector_store %arg12[%c0_8, %c0_9], %13 {strides = array<i32>} : memref<8x32xf32, #tpu.memory_space<vmem>>, vector<8x32xf32>,
    %cst_10 = arith.constant 0.000000e+00 : f32
    %15 = vector.broadcast %cst_10 : f32 to vector<8x32xf32>
    %c0_11 = arith.constant 0 : index
    %c0_12 = arith.constant 0 : index
    %16 = vector.load %arg13[%c0_11, %c0_12] : memref<8x32xf32, #tpu.memory_space<vmem>>, vector<8x32xf32>
    tpu.vector_store %arg13[%c0_11, %c0_12], %15 {strides = array<i32>} : memref<8x32xf32, #tpu.memory_space<vmem>>, vector<8x32xf32>,
    %c0_13 = arith.constant 0 : index
    %c0_14 = arith.constant 0 : index
    %17 = vector.load %arg3[%c0_13, %c0_14] : memref<32x128xf32, #tpu.memory_space<vmem>>, vector<32x128xf32>
    %c0_15 = arith.constant 0 : index
    %c0_16 = arith.constant 0 : index
    %18 = vector.load %arg10[%c0_15, %c0_16] : memref<64x128xf32, #tpu.memory_space<vmem>>, vector<8x128xf32>
    %c0_17 = arith.constant 0 : index
    %c0_18 = arith.constant 0 : index
    %19 = vector.load %arg12[%c0_17, %c0_18] : memref<8x32xf32, #tpu.memory_space<vmem>>, vector<8x32xf32>
    %cst_19 = arith.constant dense<0.000000e+00> : vector<8x128xf32>
    %20 = tpu.matmul %19, %17, %cst_19 {dimension_numbers = #tpu.dot_dimension_numbers<[1], [0], [0], [1], [0, 0, 1, 1], [], []>} : vector<8x32xf32>, vector<32x128xf32>, vector<8x128xf32> -> vector<8x128xf32>
    %21 = arith.addf %18, %20 : vector<8x128xf32>
    %c0_20 = arith.constant 0 : index
    %c0_21 = arith.constant 0 : index
    %22 = vector.load %arg13[%c0_20, %c0_21] : memref<8x32xf32, #tpu.memory_space<vmem>>, vector<8x32xf32>
    %23 = math.tanh %21 : vector<8x128xf32>
    %24 = arith.negf %21 : vector<8x128xf32>
    %25 = math.exp %24 : vector<8x128xf32>
    %cst_22 = arith.constant 1.000000e+00 : f32
    %26 = vector.broadcast %cst_22 : f32 to vector<8x128xf32>
    %27 = arith.addf %26, %25 : vector<8x128xf32>
    %28 = arith.divf %26, %27 : vector<8x128xf32>
    %29 = arith.select %5, %23, %28 : vector<8x128xi1>, vector<8x128xf32>
    %30 = vector.extract_strided_slice %29 {offsets = [0, 0], sizes = [8, 32], strides = [1, 1]} : vector<8x128xf32> to vector<8x32xf32>
    %31 = vector.extract_strided_slice %29 {offsets = [0, 32], sizes = [8, 32], strides = [1, 1]} : vector<8x128xf32> to vector<8x32xf32>
    %32 = vector.extract_strided_slice %29 {offsets = [0, 64], sizes = [8, 32], strides = [1, 1]} : vector<8x128xf32> to vector<8x32xf32>
    %33 = vector.extract_strided_slice %29 {offsets = [0, 96], sizes = [8, 32], strides = [1, 1]} : vector<8x128xf32> to vector<8x32xf32>
    %34 = arith.mulf %31, %22 : vector<8x32xf32>
    %35 = arith.mulf %30, %32 : vector<8x32xf32>
    %36 = arith.addf %34, %35 : vector<8x32xf32>
    %37 = math.tanh %36 : vector<8x32xf32>
    %38 = arith.mulf %33, %37 : vector<8x32xf32>
    %c0_23 = arith.constant 0 : index
    %c0_24 = arith.constant 0 : index
    %39 = vector.load %arg12[%c0_23, %c0_24] : memref<8x32xf32, #tpu.memory_space<vmem>>, vector<8x32xf32>
    tpu.vector_store %arg12[%c0_23, %c0_24], %38 {strides = array<i32>} : memref<8x32xf32, #tpu.memory_space<vmem>>, vector<8x32xf32>,
    %c0_25 = arith.constant 0 : index
    %c0_26 = arith.constant 0 : index
    %40 = vector.load %arg13[%c0_25, %c0_26] : memref<8x32xf32, #tpu.memory_space<vmem>>, vector<8x32xf32>
    tpu.vector_store %arg13[%c0_25, %c0_26], %36 {strides = array<i32>} : memref<8x32xf32, #tpu.memory_space<vmem>>, vector<8x32xf32>,
    %c0_27 = arith.constant 0 : index
    %c0_28 = arith.constant 0 : index
    %41 = vector.load %arg11[%c0_27, %c0_28] : memref<64x32xf32, #tpu.memory_space<vmem>>, vector<8x32xf32>
    tpu.vector_store %arg11[%c0_27, %c0_28], %38 {strides = array<i32>} : memref<64x32xf32, #tpu.memory_space<vmem>>, vector<8x32xf32>,
    %c8 = arith.constant 8 : index
    %c0_29 = arith.constant 0 : index
    %42 = vector.load %arg10[%c8, %c0_29] : memref<64x128xf32, #tpu.memory_space<vmem>>, vector<8x128xf32>
    %c0_30 = arith.constant 0 : index
    %c0_31 = arith.constant 0 : index
    %43 = vector.load %arg12[%c0_30, %c0_31] : memref<8x32xf32, #tpu.memory_space<vmem>>, vector<8x32xf32>
    %cst_32 = arith.constant dense<0.000000e+00> : vector<8x128xf32>
    %44 = tpu.matmul %43, %17, %cst_32 {dimension_numbers = #tpu.dot_dimension_numbers<[1], [0], [0], [1], [0, 0, 1, 1], [], []>} : vector<8x32xf32>, vector<32x128xf32>, vector<8x128xf32> -> vector<8x128xf32>
    %45 = arith.addf %42, %44 : vector<8x128xf32>
    %c0_33 = arith.constant 0 : index
    %c0_34 = arith.constant 0 : index
    %46 = vector.load %arg13[%c0_33, %c0_34] : memref<8x32xf32, #tpu.memory_space<vmem>>, vector<8x32xf32>
    %47 = math.tanh %45 : vector<8x128xf32>
    %48 = arith.negf %45 : vector<8x128xf32>
    %49 = math.exp %48 : vector<8x128xf32>
    %cst_35 = arith.constant 1.000000e+00 : f32
    %50 = vector.broadcast %cst_35 : f32 to vector<8x128xf32>
    %51 = arith.addf %50, %49 : vector<8x128xf32>
    %52 = arith.divf %50, %51 : vector<8x128xf32>
    %53 = arith.select %5, %47, %52 : vector<8x128xi1>, vector<8x128xf32>
    %54 = vector.extract_strided_slice %53 {offsets = [0, 0], sizes = [8, 32], strides = [1, 1]} : vector<8x128xf32> to vector<8x32xf32>
    %55 = vector.extract_strided_slice %53 {offsets = [0, 32], sizes = [8, 32], strides = [1, 1]} : vector<8x128xf32> to vector<8x32xf32>
    %56 = vector.extract_strided_slice %53 {offsets = [0, 64], sizes = [8, 32], strides = [1, 1]} : vector<8x128xf32> to vector<8x32xf32>
    %57 = vector.extract_strided_slice %53 {offsets = [0, 96], sizes = [8, 32], strides = [1, 1]} : vector<8x128xf32> to vector<8x32xf32>
    %58 = arith.mulf %55, %46 : vector<8x32xf32>
    %59 = arith.mulf %54, %56 : vector<8x32xf32>
    %60 = arith.addf %58, %59 : vector<8x32xf32>
    %61 = math.tanh %60 : vector<8x32xf32>
    %62 = arith.mulf %57, %61 : vector<8x32xf32>
    %c0_36 = arith.constant 0 : index
    %c0_37 = arith.constant 0 : index
    %63 = vector.load %arg12[%c0_36, %c0_37] : memref<8x32xf32, #tpu.memory_space<vmem>>, vector<8x32xf32>
    tpu.vector_store %arg12[%c0_36, %c0_37], %62 {strides = array<i32>} : memref<8x32xf32, #tpu.memory_space<vmem>>, vector<8x32xf32>,
    %c0_38 = arith.constant 0 : index
    %c0_39 = arith.constant 0 : index
    %64 = vector.load %arg13[%c0_38, %c0_39] : memref<8x32xf32, #tpu.memory_space<vmem>>, vector<8x32xf32>
    tpu.vector_store %arg13[%c0_38, %c0_39], %60 {strides = array<i32>} : memref<8x32xf32, #tpu.memory_space<vmem>>, vector<8x32xf32>,
    %c8_40 = arith.constant 8 : index
    %c0_41 = arith.constant 0 : index
    %65 = vector.load %arg11[%c8_40, %c0_41] : memref<64x32xf32, #tpu.memory_space<vmem>>, vector<8x32xf32>
    tpu.vector_store %arg11[%c8_40, %c0_41], %62 {strides = array<i32>} : memref<64x32xf32, #tpu.memory_space<vmem>>, vector<8x32xf32>,
    %c16 = arith.constant 16 : index
    %c0_42 = arith.constant 0 : index
    %66 = vector.load %arg10[%c16, %c0_42] : memref<64x128xf32, #tpu.memory_space<vmem>>, vector<8x128xf32>
    %c0_43 = arith.constant 0 : index
    %c0_44 = arith.constant 0 : index
    %67 = vector.load %arg12[%c0_43, %c0_44] : memref<8x32xf32, #tpu.memory_space<vmem>>, vector<8x32xf32>
    %cst_45 = arith.constant dense<0.000000e+00> : vector<8x128xf32>
    %68 = tpu.matmul %67, %17, %cst_45 {dimension_numbers = #tpu.dot_dimension_numbers<[1], [0], [0], [1], [0, 0, 1, 1], [], []>} : vector<8x32xf32>, vector<32x128xf32>, vector<8x128xf32> -> vector<8x128xf32>
    %69 = arith.addf %66, %68 : vector<8x128xf32>
    %c0_46 = arith.constant 0 : index
    %c0_47 = arith.constant 0 : index
    %70 = vector.load %arg13[%c0_46, %c0_47] : memref<8x32xf32, #tpu.memory_space<vmem>>, vector<8x32xf32>
    %71 = math.tanh %69 : vector<8x128xf32>
    %72 = arith.negf %69 : vector<8x128xf32>
    %73 = math.exp %72 : vector<8x128xf32>
    %cst_48 = arith.constant 1.000000e+00 : f32
    %74 = vector.broadcast %cst_48 : f32 to vector<8x128xf32>
    %75 = arith.addf %74, %73 : vector<8x128xf32>
    %76 = arith.divf %74, %75 : vector<8x128xf32>
    %77 = arith.select %5, %71, %76 : vector<8x128xi1>, vector<8x128xf32>
    %78 = vector.extract_strided_slice %77 {offsets = [0, 0], sizes = [8, 32], strides = [1, 1]} : vector<8x128xf32> to vector<8x32xf32>
    %79 = vector.extract_strided_slice %77 {offsets = [0, 32], sizes = [8, 32], strides = [1, 1]} : vector<8x128xf32> to vector<8x32xf32>
    %80 = vector.extract_strided_slice %77 {offsets = [0, 64], sizes = [8, 32], strides = [1, 1]} : vector<8x128xf32> to vector<8x32xf32>
    %81 = vector.extract_strided_slice %77 {offsets = [0, 96], sizes = [8, 32], strides = [1, 1]} : vector<8x128xf32> to vector<8x32xf32>
    %82 = arith.mulf %79, %70 : vector<8x32xf32>
    %83 = arith.mulf %78, %80 : vector<8x32xf32>
    %84 = arith.addf %82, %83 : vector<8x32xf32>
    %85 = math.tanh %84 : vector<8x32xf32>
    %86 = arith.mulf %81, %85 : vector<8x32xf32>
    %c0_49 = arith.constant 0 : index
    %c0_50 = arith.constant 0 : index
    %87 = vector.load %arg12[%c0_49, %c0_50] : memref<8x32xf32, #tpu.memory_space<vmem>>, vector<8x32xf32>
    tpu.vector_store %arg12[%c0_49, %c0_50], %86 {strides = array<i32>} : memref<8x32xf32, #tpu.memory_space<vmem>>, vector<8x32xf32>,
    %c0_51 = arith.constant 0 : index
    %c0_52 = arith.constant 0 : index
    %88 = vector.load %arg13[%c0_51, %c0_52] : memref<8x32xf32, #tpu.memory_space<vmem>>, vector<8x32xf32>
    tpu.vector_store %arg13[%c0_51, %c0_52], %84 {strides = array<i32>} : memref<8x32xf32, #tpu.memory_space<vmem>>, vector<8x32xf32>,
    %c16_53 = arith.constant 16 : index
    %c0_54 = arith.constant 0 : index
    %89 = vector.load %arg11[%c16_53, %c0_54] : memref<64x32xf32, #tpu.memory_space<vmem>>, vector<8x32xf32>
    tpu.vector_store %arg11[%c16_53, %c0_54], %86 {strides = array<i32>} : memref<64x32xf32, #tpu.memory_space<vmem>>, vector<8x32xf32>,
    %c24 = arith.constant 24 : index
    %c0_55 = arith.constant 0 : index
    %90 = vector.load %arg10[%c24, %c0_55] : memref<64x128xf32, #tpu.memory_space<vmem>>, vector<8x128xf32>
    %c0_56 = arith.constant 0 : index
    %c0_57 = arith.constant 0 : index
    %91 = vector.load %arg12[%c0_56, %c0_57] : memref<8x32xf32, #tpu.memory_space<vmem>>, vector<8x32xf32>
    %cst_58 = arith.constant dense<0.000000e+00> : vector<8x128xf32>
    %92 = tpu.matmul %91, %17, %cst_58 {dimension_numbers = #tpu.dot_dimension_numbers<[1], [0], [0], [1], [0, 0, 1, 1], [], []>} : vector<8x32xf32>, vector<32x128xf32>, vector<8x128xf32> -> vector<8x128xf32>
    %93 = arith.addf %90, %92 : vector<8x128xf32>
    %c0_59 = arith.constant 0 : index
    %c0_60 = arith.constant 0 : index
    %94 = vector.load %arg13[%c0_59, %c0_60] : memref<8x32xf32, #tpu.memory_space<vmem>>, vector<8x32xf32>
    %95 = math.tanh %93 : vector<8x128xf32>
    %96 = arith.negf %93 : vector<8x128xf32>
    %97 = math.exp %96 : vector<8x128xf32>
    %cst_61 = arith.constant 1.000000e+00 : f32
    %98 = vector.broadcast %cst_61 : f32 to vector<8x128xf32>
    %99 = arith.addf %98, %97 : vector<8x128xf32>
    %100 = arith.divf %98, %99 : vector<8x128xf32>
    %101 = arith.select %5, %95, %100 : vector<8x128xi1>, vector<8x128xf32>
    %102 = vector.extract_strided_slice %101 {offsets = [0, 0], sizes = [8, 32], strides = [1, 1]} : vector<8x128xf32> to vector<8x32xf32>
    %103 = vector.extract_strided_slice %101 {offsets = [0, 32], sizes = [8, 32], strides = [1, 1]} : vector<8x128xf32> to vector<8x32xf32>
    %104 = vector.extract_strided_slice %101 {offsets = [0, 64], sizes = [8, 32], strides = [1, 1]} : vector<8x128xf32> to vector<8x32xf32>
    %105 = vector.extract_strided_slice %101 {offsets = [0, 96], sizes = [8, 32], strides = [1, 1]} : vector<8x128xf32> to vector<8x32xf32>
    %106 = arith.mulf %103, %94 : vector<8x32xf32>
    %107 = arith.mulf %102, %104 : vector<8x32xf32>
    %108 = arith.addf %106, %107 : vector<8x32xf32>
    %109 = math.tanh %108 : vector<8x32xf32>
    %110 = arith.mulf %105, %109 : vector<8x32xf32>
    %c0_62 = arith.constant 0 : index
    %c0_63 = arith.constant 0 : index
    %111 = vector.load %arg12[%c0_62, %c0_63] : memref<8x32xf32, #tpu.memory_space<vmem>>, vector<8x32xf32>
    tpu.vector_store %arg12[%c0_62, %c0_63], %110 {strides = array<i32>} : memref<8x32xf32, #tpu.memory_space<vmem>>, vector<8x32xf32>,
    %c0_64 = arith.constant 0 : index
    %c0_65 = arith.constant 0 : index
    %112 = vector.load %arg13[%c0_64, %c0_65] : memref<8x32xf32, #tpu.memory_space<vmem>>, vector<8x32xf32>
    tpu.vector_store %arg13[%c0_64, %c0_65], %108 {strides = array<i32>} : memref<8x32xf32, #tpu.memory_space<vmem>>, vector<8x32xf32>,
    %c24_66 = arith.constant 24 : index
    %c0_67 = arith.constant 0 : index
    %113 = vector.load %arg11[%c24_66, %c0_67] : memref<64x32xf32, #tpu.memory_space<vmem>>, vector<8x32xf32>
    tpu.vector_store %arg11[%c24_66, %c0_67], %110 {strides = array<i32>} : memref<64x32xf32, #tpu.memory_space<vmem>>, vector<8x32xf32>,
    %c32 = arith.constant 32 : index
    %c0_68 = arith.constant 0 : index
    %114 = vector.load %arg10[%c32, %c0_68] : memref<64x128xf32, #tpu.memory_space<vmem>>, vector<8x128xf32>
    %c0_69 = arith.constant 0 : index
    %c0_70 = arith.constant 0 : index
    %115 = vector.load %arg12[%c0_69, %c0_70] : memref<8x32xf32, #tpu.memory_space<vmem>>, vector<8x32xf32>
    %cst_71 = arith.constant dense<0.000000e+00> : vector<8x128xf32>
    %116 = tpu.matmul %115, %17, %cst_71 {dimension_numbers = #tpu.dot_dimension_numbers<[1], [0], [0], [1], [0, 0, 1, 1], [], []>} : vector<8x32xf32>, vector<32x128xf32>, vector<8x128xf32> -> vector<8x128xf32>
    %117 = arith.addf %114, %116 : vector<8x128xf32>
    %c0_72 = arith.constant 0 : index
    %c0_73 = arith.constant 0 : index
    %118 = vector.load %arg13[%c0_72, %c0_73] : memref<8x32xf32, #tpu.memory_space<vmem>>, vector<8x32xf32>
    %119 = math.tanh %117 : vector<8x128xf32>
    %120 = arith.negf %117 : vector<8x128xf32>
    %121 = math.exp %120 : vector<8x128xf32>
    %cst_74 = arith.constant 1.000000e+00 : f32
    %122 = vector.broadcast %cst_74 : f32 to vector<8x128xf32>
    %123 = arith.addf %122, %121 : vector<8x128xf32>
    %124 = arith.divf %122, %123 : vector<8x128xf32>
    %125 = arith.select %5, %119, %124 : vector<8x128xi1>, vector<8x128xf32>
    %126 = vector.extract_strided_slice %125 {offsets = [0, 0], sizes = [8, 32], strides = [1, 1]} : vector<8x128xf32> to vector<8x32xf32>
    %127 = vector.extract_strided_slice %125 {offsets = [0, 32], sizes = [8, 32], strides = [1, 1]} : vector<8x128xf32> to vector<8x32xf32>
    %128 = vector.extract_strided_slice %125 {offsets = [0, 64], sizes = [8, 32], strides = [1, 1]} : vector<8x128xf32> to vector<8x32xf32>
    %129 = vector.extract_strided_slice %125 {offsets = [0, 96], sizes = [8, 32], strides = [1, 1]} : vector<8x128xf32> to vector<8x32xf32>
    %130 = arith.mulf %127, %118 : vector<8x32xf32>
    %131 = arith.mulf %126, %128 : vector<8x32xf32>
    %132 = arith.addf %130, %131 : vector<8x32xf32>
    %133 = math.tanh %132 : vector<8x32xf32>
    %134 = arith.mulf %129, %133 : vector<8x32xf32>
    %c0_75 = arith.constant 0 : index
    %c0_76 = arith.constant 0 : index
    %135 = vector.load %arg12[%c0_75, %c0_76] : memref<8x32xf32, #tpu.memory_space<vmem>>, vector<8x32xf32>
    tpu.vector_store %arg12[%c0_75, %c0_76], %134 {strides = array<i32>} : memref<8x32xf32, #tpu.memory_space<vmem>>, vector<8x32xf32>,
    %c0_77 = arith.constant 0 : index
    %c0_78 = arith.constant 0 : index
    %136 = vector.load %arg13[%c0_77, %c0_78] : memref<8x32xf32, #tpu.memory_space<vmem>>, vector<8x32xf32>
    tpu.vector_store %arg13[%c0_77, %c0_78], %132 {strides = array<i32>} : memref<8x32xf32, #tpu.memory_space<vmem>>, vector<8x32xf32>,
    %c32_79 = arith.constant 32 : index
    %c0_80 = arith.constant 0 : index
    %137 = vector.load %arg11[%c32_79, %c0_80] : memref<64x32xf32, #tpu.memory_space<vmem>>, vector<8x32xf32>
    tpu.vector_store %arg11[%c32_79, %c0_80], %134 {strides = array<i32>} : memref<64x32xf32, #tpu.memory_space<vmem>>, vector<8x32xf32>,
    %c40 = arith.constant 40 : index
    %c0_81 = arith.constant 0 : index
    %138 = vector.load %arg10[%c40, %c0_81] : memref<64x128xf32, #tpu.memory_space<vmem>>, vector<8x128xf32>
    %c0_82 = arith.constant 0 : index
    %c0_83 = arith.constant 0 : index
    %139 = vector.load %arg12[%c0_82, %c0_83] : memref<8x32xf32, #tpu.memory_space<vmem>>, vector<8x32xf32>
    %cst_84 = arith.constant dense<0.000000e+00> : vector<8x128xf32>
    %140 = tpu.matmul %139, %17, %cst_84 {dimension_numbers = #tpu.dot_dimension_numbers<[1], [0], [0], [1], [0, 0, 1, 1], [], []>} : vector<8x32xf32>, vector<32x128xf32>, vector<8x128xf32> -> vector<8x128xf32>
    %141 = arith.addf %138, %140 : vector<8x128xf32>
    %c0_85 = arith.constant 0 : index
    %c0_86 = arith.constant 0 : index
    %142 = vector.load %arg13[%c0_85, %c0_86] : memref<8x32xf32, #tpu.memory_space<vmem>>, vector<8x32xf32>
    %143 = math.tanh %141 : vector<8x128xf32>
    %144 = arith.negf %141 : vector<8x128xf32>
    %145 = math.exp %144 : vector<8x128xf32>
    %cst_87 = arith.constant 1.000000e+00 : f32
    %146 = vector.broadcast %cst_87 : f32 to vector<8x128xf32>
    %147 = arith.addf %146, %145 : vector<8x128xf32>
    %148 = arith.divf %146, %147 : vector<8x128xf32>
    %149 = arith.select %5, %143, %148 : vector<8x128xi1>, vector<8x128xf32>
    %150 = vector.extract_strided_slice %149 {offsets = [0, 0], sizes = [8, 32], strides = [1, 1]} : vector<8x128xf32> to vector<8x32xf32>
    %151 = vector.extract_strided_slice %149 {offsets = [0, 32], sizes = [8, 32], strides = [1, 1]} : vector<8x128xf32> to vector<8x32xf32>
    %152 = vector.extract_strided_slice %149 {offsets = [0, 64], sizes = [8, 32], strides = [1, 1]} : vector<8x128xf32> to vector<8x32xf32>
    %153 = vector.extract_strided_slice %149 {offsets = [0, 96], sizes = [8, 32], strides = [1, 1]} : vector<8x128xf32> to vector<8x32xf32>
    %154 = arith.mulf %151, %142 : vector<8x32xf32>
    %155 = arith.mulf %150, %152 : vector<8x32xf32>
    %156 = arith.addf %154, %155 : vector<8x32xf32>
    %157 = math.tanh %156 : vector<8x32xf32>
    %158 = arith.mulf %153, %157 : vector<8x32xf32>
    %c0_88 = arith.constant 0 : index
    %c0_89 = arith.constant 0 : index
    %159 = vector.load %arg12[%c0_88, %c0_89] : memref<8x32xf32, #tpu.memory_space<vmem>>, vector<8x32xf32>
    tpu.vector_store %arg12[%c0_88, %c0_89], %158 {strides = array<i32>} : memref<8x32xf32, #tpu.memory_space<vmem>>, vector<8x32xf32>,
    %c0_90 = arith.constant 0 : index
    %c0_91 = arith.constant 0 : index
    %160 = vector.load %arg13[%c0_90, %c0_91] : memref<8x32xf32, #tpu.memory_space<vmem>>, vector<8x32xf32>
    tpu.vector_store %arg13[%c0_90, %c0_91], %156 {strides = array<i32>} : memref<8x32xf32, #tpu.memory_space<vmem>>, vector<8x32xf32>,
    %c40_92 = arith.constant 40 : index
    %c0_93 = arith.constant 0 : index
    %161 = vector.load %arg11[%c40_92, %c0_93] : memref<64x32xf32, #tpu.memory_space<vmem>>, vector<8x32xf32>
    tpu.vector_store %arg11[%c40_92, %c0_93], %158 {strides = array<i32>} : memref<64x32xf32, #tpu.memory_space<vmem>>, vector<8x32xf32>,
    %c48 = arith.constant 48 : index
    %c0_94 = arith.constant 0 : index
    %162 = vector.load %arg10[%c48, %c0_94] : memref<64x128xf32, #tpu.memory_space<vmem>>, vector<8x128xf32>
    %c0_95 = arith.constant 0 : index
    %c0_96 = arith.constant 0 : index
    %163 = vector.load %arg12[%c0_95, %c0_96] : memref<8x32xf32, #tpu.memory_space<vmem>>, vector<8x32xf32>
    %cst_97 = arith.constant dense<0.000000e+00> : vector<8x128xf32>
    %164 = tpu.matmul %163, %17, %cst_97 {dimension_numbers = #tpu.dot_dimension_numbers<[1], [0], [0], [1], [0, 0, 1, 1], [], []>} : vector<8x32xf32>, vector<32x128xf32>, vector<8x128xf32> -> vector<8x128xf32>
    %165 = arith.addf %162, %164 : vector<8x128xf32>
    %c0_98 = arith.constant 0 : index
    %c0_99 = arith.constant 0 : index
    %166 = vector.load %arg13[%c0_98, %c0_99] : memref<8x32xf32, #tpu.memory_space<vmem>>, vector<8x32xf32>
    %167 = math.tanh %165 : vector<8x128xf32>
    %168 = arith.negf %165 : vector<8x128xf32>
    %169 = math.exp %168 : vector<8x128xf32>
    %cst_100 = arith.constant 1.000000e+00 : f32
    %170 = vector.broadcast %cst_100 : f32 to vector<8x128xf32>
    %171 = arith.addf %170, %169 : vector<8x128xf32>
    %172 = arith.divf %170, %171 : vector<8x128xf32>
    %173 = arith.select %5, %167, %172 : vector<8x128xi1>, vector<8x128xf32>
    %174 = vector.extract_strided_slice %173 {offsets = [0, 0], sizes = [8, 32], strides = [1, 1]} : vector<8x128xf32> to vector<8x32xf32>
    %175 = vector.extract_strided_slice %173 {offsets = [0, 32], sizes = [8, 32], strides = [1, 1]} : vector<8x128xf32> to vector<8x32xf32>
    %176 = vector.extract_strided_slice %173 {offsets = [0, 64], sizes = [8, 32], strides = [1, 1]} : vector<8x128xf32> to vector<8x32xf32>
    %177 = vector.extract_strided_slice %173 {offsets = [0, 96], sizes = [8, 32], strides = [1, 1]} : vector<8x128xf32> to vector<8x32xf32>
    %178 = arith.mulf %175, %166 : vector<8x32xf32>
    %179 = arith.mulf %174, %176 : vector<8x32xf32>
    %180 = arith.addf %178, %179 : vector<8x32xf32>
    %181 = math.tanh %180 : vector<8x32xf32>
    %182 = arith.mulf %177, %181 : vector<8x32xf32>
    %c0_101 = arith.constant 0 : index
    %c0_102 = arith.constant 0 : index
    %183 = vector.load %arg12[%c0_101, %c0_102] : memref<8x32xf32, #tpu.memory_space<vmem>>, vector<8x32xf32>
    tpu.vector_store %arg12[%c0_101, %c0_102], %182 {strides = array<i32>} : memref<8x32xf32, #tpu.memory_space<vmem>>, vector<8x32xf32>,
    %c0_103 = arith.constant 0 : index
    %c0_104 = arith.constant 0 : index
    %184 = vector.load %arg13[%c0_103, %c0_104] : memref<8x32xf32, #tpu.memory_space<vmem>>, vector<8x32xf32>
    tpu.vector_store %arg13[%c0_103, %c0_104], %180 {strides = array<i32>} : memref<8x32xf32, #tpu.memory_space<vmem>>, vector<8x32xf32>,
    %c48_105 = arith.constant 48 : index
    %c0_106 = arith.constant 0 : index
    %185 = vector.load %arg11[%c48_105, %c0_106] : memref<64x32xf32, #tpu.memory_space<vmem>>, vector<8x32xf32>
    tpu.vector_store %arg11[%c48_105, %c0_106], %182 {strides = array<i32>} : memref<64x32xf32, #tpu.memory_space<vmem>>, vector<8x32xf32>,
    %c56 = arith.constant 56 : index
    %c0_107 = arith.constant 0 : index
    %186 = vector.load %arg10[%c56, %c0_107] : memref<64x128xf32, #tpu.memory_space<vmem>>, vector<8x128xf32>
    %c0_108 = arith.constant 0 : index
    %c0_109 = arith.constant 0 : index
    %187 = vector.load %arg12[%c0_108, %c0_109] : memref<8x32xf32, #tpu.memory_space<vmem>>, vector<8x32xf32>
    %cst_110 = arith.constant dense<0.000000e+00> : vector<8x128xf32>
    %188 = tpu.matmul %187, %17, %cst_110 {dimension_numbers = #tpu.dot_dimension_numbers<[1], [0], [0], [1], [0, 0, 1, 1], [], []>} : vector<8x32xf32>, vector<32x128xf32>, vector<8x128xf32> -> vector<8x128xf32>
    %189 = arith.addf %186, %188 : vector<8x128xf32>
    %c0_111 = arith.constant 0 : index
    %c0_112 = arith.constant 0 : index
    %190 = vector.load %arg13[%c0_111, %c0_112] : memref<8x32xf32, #tpu.memory_space<vmem>>, vector<8x32xf32>
    %191 = math.tanh %189 : vector<8x128xf32>
    %192 = arith.negf %189 : vector<8x128xf32>
    %193 = math.exp %192 : vector<8x128xf32>
    %cst_113 = arith.constant 1.000000e+00 : f32
    %194 = vector.broadcast %cst_113 : f32 to vector<8x128xf32>
    %195 = arith.addf %194, %193 : vector<8x128xf32>
    %196 = arith.divf %194, %195 : vector<8x128xf32>
    %197 = arith.select %5, %191, %196 : vector<8x128xi1>, vector<8x128xf32>
    %198 = vector.extract_strided_slice %197 {offsets = [0, 0], sizes = [8, 32], strides = [1, 1]} : vector<8x128xf32> to vector<8x32xf32>
    %199 = vector.extract_strided_slice %197 {offsets = [0, 32], sizes = [8, 32], strides = [1, 1]} : vector<8x128xf32> to vector<8x32xf32>
    %200 = vector.extract_strided_slice %197 {offsets = [0, 64], sizes = [8, 32], strides = [1, 1]} : vector<8x128xf32> to vector<8x32xf32>
    %201 = vector.extract_strided_slice %197 {offsets = [0, 96], sizes = [8, 32], strides = [1, 1]} : vector<8x128xf32> to vector<8x32xf32>
    %202 = arith.mulf %199, %190 : vector<8x32xf32>
    %203 = arith.mulf %198, %200 : vector<8x32xf32>
    %204 = arith.addf %202, %203 : vector<8x32xf32>
    %205 = math.tanh %204 : vector<8x32xf32>
    %206 = arith.mulf %201, %205 : vector<8x32xf32>
    %c0_114 = arith.constant 0 : index
    %c0_115 = arith.constant 0 : index
    %207 = vector.load %arg12[%c0_114, %c0_115] : memref<8x32xf32, #tpu.memory_space<vmem>>, vector<8x32xf32>
    tpu.vector_store %arg12[%c0_114, %c0_115], %206 {strides = array<i32>} : memref<8x32xf32, #tpu.memory_space<vmem>>, vector<8x32xf32>,
    %c0_116 = arith.constant 0 : index
    %c0_117 = arith.constant 0 : index
    %208 = vector.load %arg13[%c0_116, %c0_117] : memref<8x32xf32, #tpu.memory_space<vmem>>, vector<8x32xf32>
    tpu.vector_store %arg13[%c0_116, %c0_117], %204 {strides = array<i32>} : memref<8x32xf32, #tpu.memory_space<vmem>>, vector<8x32xf32>,
    %c56_118 = arith.constant 56 : index
    %c0_119 = arith.constant 0 : index
    %209 = vector.load %arg11[%c56_118, %c0_119] : memref<64x32xf32, #tpu.memory_space<vmem>>, vector<8x32xf32>
    tpu.vector_store %arg11[%c56_118, %c0_119], %206 {strides = array<i32>} : memref<64x32xf32, #tpu.memory_space<vmem>>, vector<8x32xf32>,
    %c0_120 = arith.constant 0 : index
    %c0_121 = arith.constant 0 : index
    %210 = vector.load %arg11[%c0_120, %c0_121] : memref<64x32xf32, #tpu.memory_space<vmem>>, vector<64x32xf32>
    %c0_122 = arith.constant 0 : index
    %c0_123 = arith.constant 0 : index
    %211 = vector.load %arg4[%c0_122, %c0_123] : memref<32x128xf32, #tpu.memory_space<vmem>>, vector<32x128xf32>
    %cst_124 = arith.constant dense<0.000000e+00> : vector<64x128xf32>
    %212 = tpu.matmul %210, %211, %cst_124 {dimension_numbers = #tpu.dot_dimension_numbers<[1], [0], [0], [1], [0, 0, 1, 1], [], []>} : vector<64x32xf32>, vector<32x128xf32>, vector<64x128xf32> -> vector<64x128xf32>
    %c0_125 = arith.constant 0 : index
    %c0_126 = arith.constant 0 : index
    %213 = vector.load %arg5[%c0_125, %c0_126] : memref<1x128xf32, #tpu.memory_space<vmem>>, vector<1x128xf32>
    %214 = vector.broadcast %213 : vector<1x128xf32> to vector<64x128xf32>
    %215 = arith.addf %212, %214 : vector<64x128xf32>
    %c0_127 = arith.constant 0 : index
    %c0_128 = arith.constant 0 : index
    %216 = vector.load %arg10[%c0_127, %c0_128] : memref<64x128xf32, #tpu.memory_space<vmem>>, vector<64x128xf32>
    tpu.vector_store %arg10[%c0_127, %c0_128], %215 {strides = array<i32>} : memref<64x128xf32, #tpu.memory_space<vmem>>, vector<64x128xf32>,
    %cst_129 = arith.constant 0.000000e+00 : f32
    %217 = vector.broadcast %cst_129 : f32 to vector<8x32xf32>
    %c0_130 = arith.constant 0 : index
    %c0_131 = arith.constant 0 : index
    %218 = vector.load %arg12[%c0_130, %c0_131] : memref<8x32xf32, #tpu.memory_space<vmem>>, vector<8x32xf32>
    tpu.vector_store %arg12[%c0_130, %c0_131], %217 {strides = array<i32>} : memref<8x32xf32, #tpu.memory_space<vmem>>, vector<8x32xf32>,
    %cst_132 = arith.constant 0.000000e+00 : f32
    %219 = vector.broadcast %cst_132 : f32 to vector<8x32xf32>
    %c0_133 = arith.constant 0 : index
    %c0_134 = arith.constant 0 : index
    %220 = vector.load %arg13[%c0_133, %c0_134] : memref<8x32xf32, #tpu.memory_space<vmem>>, vector<8x32xf32>
    tpu.vector_store %arg13[%c0_133, %c0_134], %219 {strides = array<i32>} : memref<8x32xf32, #tpu.memory_space<vmem>>, vector<8x32xf32>,
    %c0_135 = arith.constant 0 : index
    %c0_136 = arith.constant 0 : index
    %221 = vector.load %arg6[%c0_135, %c0_136] : memref<32x128xf32, #tpu.memory_space<vmem>>, vector<32x128xf32>
    %c0_137 = arith.constant 0 : index
    %c0_138 = arith.constant 0 : index
    %222 = vector.load %arg10[%c0_137, %c0_138] : memref<64x128xf32, #tpu.memory_space<vmem>>, vector<8x128xf32>
    %c0_139 = arith.constant 0 : index
    %c0_140 = arith.constant 0 : index
    %223 = vector.load %arg12[%c0_139, %c0_140] : memref<8x32xf32, #tpu.memory_space<vmem>>, vector<8x32xf32>
    %cst_141 = arith.constant dense<0.000000e+00> : vector<8x128xf32>
    %224 = tpu.matmul %223, %221, %cst_141 {dimension_numbers = #tpu.dot_dimension_numbers<[1], [0], [0], [1], [0, 0, 1, 1], [], []>} : vector<8x32xf32>, vector<32x128xf32>, vector<8x128xf32> -> vector<8x128xf32>
    %225 = arith.addf %222, %224 : vector<8x128xf32>
    %c0_142 = arith.constant 0 : index
    %c0_143 = arith.constant 0 : index
    %226 = vector.load %arg13[%c0_142, %c0_143] : memref<8x32xf32, #tpu.memory_space<vmem>>, vector<8x32xf32>
    %227 = math.tanh %225 : vector<8x128xf32>
    %228 = arith.negf %225 : vector<8x128xf32>
    %229 = math.exp %228 : vector<8x128xf32>
    %cst_144 = arith.constant 1.000000e+00 : f32
    %230 = vector.broadcast %cst_144 : f32 to vector<8x128xf32>
    %231 = arith.addf %230, %229 : vector<8x128xf32>
    %232 = arith.divf %230, %231 : vector<8x128xf32>
    %233 = arith.select %5, %227, %232 : vector<8x128xi1>, vector<8x128xf32>
    %234 = vector.extract_strided_slice %233 {offsets = [0, 0], sizes = [8, 32], strides = [1, 1]} : vector<8x128xf32> to vector<8x32xf32>
    %235 = vector.extract_strided_slice %233 {offsets = [0, 32], sizes = [8, 32], strides = [1, 1]} : vector<8x128xf32> to vector<8x32xf32>
    %236 = vector.extract_strided_slice %233 {offsets = [0, 64], sizes = [8, 32], strides = [1, 1]} : vector<8x128xf32> to vector<8x32xf32>
    %237 = vector.extract_strided_slice %233 {offsets = [0, 96], sizes = [8, 32], strides = [1, 1]} : vector<8x128xf32> to vector<8x32xf32>
    %238 = arith.mulf %235, %226 : vector<8x32xf32>
    %239 = arith.mulf %234, %236 : vector<8x32xf32>
    %240 = arith.addf %238, %239 : vector<8x32xf32>
    %241 = math.tanh %240 : vector<8x32xf32>
    %242 = arith.mulf %237, %241 : vector<8x32xf32>
    %c0_145 = arith.constant 0 : index
    %c0_146 = arith.constant 0 : index
    %243 = vector.load %arg12[%c0_145, %c0_146] : memref<8x32xf32, #tpu.memory_space<vmem>>, vector<8x32xf32>
    tpu.vector_store %arg12[%c0_145, %c0_146], %242 {strides = array<i32>} : memref<8x32xf32, #tpu.memory_space<vmem>>, vector<8x32xf32>,
    %c0_147 = arith.constant 0 : index
    %c0_148 = arith.constant 0 : index
    %244 = vector.load %arg13[%c0_147, %c0_148] : memref<8x32xf32, #tpu.memory_space<vmem>>, vector<8x32xf32>
    tpu.vector_store %arg13[%c0_147, %c0_148], %240 {strides = array<i32>} : memref<8x32xf32, #tpu.memory_space<vmem>>, vector<8x32xf32>,
    %c8_149 = arith.constant 8 : index
    %c0_150 = arith.constant 0 : index
    %245 = vector.load %arg10[%c8_149, %c0_150] : memref<64x128xf32, #tpu.memory_space<vmem>>, vector<8x128xf32>
    %c0_151 = arith.constant 0 : index
    %c0_152 = arith.constant 0 : index
    %246 = vector.load %arg12[%c0_151, %c0_152] : memref<8x32xf32, #tpu.memory_space<vmem>>, vector<8x32xf32>
    %cst_153 = arith.constant dense<0.000000e+00> : vector<8x128xf32>
    %247 = tpu.matmul %246, %221, %cst_153 {dimension_numbers = #tpu.dot_dimension_numbers<[1], [0], [0], [1], [0, 0, 1, 1], [], []>} : vector<8x32xf32>, vector<32x128xf32>, vector<8x128xf32> -> vector<8x128xf32>
    %248 = arith.addf %245, %247 : vector<8x128xf32>
    %c0_154 = arith.constant 0 : index
    %c0_155 = arith.constant 0 : index
    %249 = vector.load %arg13[%c0_154, %c0_155] : memref<8x32xf32, #tpu.memory_space<vmem>>, vector<8x32xf32>
    %250 = math.tanh %248 : vector<8x128xf32>
    %251 = arith.negf %248 : vector<8x128xf32>
    %252 = math.exp %251 : vector<8x128xf32>
    %cst_156 = arith.constant 1.000000e+00 : f32
    %253 = vector.broadcast %cst_156 : f32 to vector<8x128xf32>
    %254 = arith.addf %253, %252 : vector<8x128xf32>
    %255 = arith.divf %253, %254 : vector<8x128xf32>
    %256 = arith.select %5, %250, %255 : vector<8x128xi1>, vector<8x128xf32>
    %257 = vector.extract_strided_slice %256 {offsets = [0, 0], sizes = [8, 32], strides = [1, 1]} : vector<8x128xf32> to vector<8x32xf32>
    %258 = vector.extract_strided_slice %256 {offsets = [0, 32], sizes = [8, 32], strides = [1, 1]} : vector<8x128xf32> to vector<8x32xf32>
    %259 = vector.extract_strided_slice %256 {offsets = [0, 64], sizes = [8, 32], strides = [1, 1]} : vector<8x128xf32> to vector<8x32xf32>
    %260 = vector.extract_strided_slice %256 {offsets = [0, 96], sizes = [8, 32], strides = [1, 1]} : vector<8x128xf32> to vector<8x32xf32>
    %261 = arith.mulf %258, %249 : vector<8x32xf32>
    %262 = arith.mulf %257, %259 : vector<8x32xf32>
    %263 = arith.addf %261, %262 : vector<8x32xf32>
    %264 = math.tanh %263 : vector<8x32xf32>
    %265 = arith.mulf %260, %264 : vector<8x32xf32>
    %c0_157 = arith.constant 0 : index
    %c0_158 = arith.constant 0 : index
    %266 = vector.load %arg12[%c0_157, %c0_158] : memref<8x32xf32, #tpu.memory_space<vmem>>, vector<8x32xf32>
    tpu.vector_store %arg12[%c0_157, %c0_158], %265 {strides = array<i32>} : memref<8x32xf32, #tpu.memory_space<vmem>>, vector<8x32xf32>,
    %c0_159 = arith.constant 0 : index
    %c0_160 = arith.constant 0 : index
    %267 = vector.load %arg13[%c0_159, %c0_160] : memref<8x32xf32, #tpu.memory_space<vmem>>, vector<8x32xf32>
    tpu.vector_store %arg13[%c0_159, %c0_160], %263 {strides = array<i32>} : memref<8x32xf32, #tpu.memory_space<vmem>>, vector<8x32xf32>,
    %c16_161 = arith.constant 16 : index
    %c0_162 = arith.constant 0 : index
    %268 = vector.load %arg10[%c16_161, %c0_162] : memref<64x128xf32, #tpu.memory_space<vmem>>, vector<8x128xf32>
    %c0_163 = arith.constant 0 : index
    %c0_164 = arith.constant 0 : index
    %269 = vector.load %arg12[%c0_163, %c0_164] : memref<8x32xf32, #tpu.memory_space<vmem>>, vector<8x32xf32>
    %cst_165 = arith.constant dense<0.000000e+00> : vector<8x128xf32>
    %270 = tpu.matmul %269, %221, %cst_165 {dimension_numbers = #tpu.dot_dimension_numbers<[1], [0], [0], [1], [0, 0, 1, 1], [], []>} : vector<8x32xf32>, vector<32x128xf32>, vector<8x128xf32> -> vector<8x128xf32>
    %271 = arith.addf %268, %270 : vector<8x128xf32>
    %c0_166 = arith.constant 0 : index
    %c0_167 = arith.constant 0 : index
    %272 = vector.load %arg13[%c0_166, %c0_167] : memref<8x32xf32, #tpu.memory_space<vmem>>, vector<8x32xf32>
    %273 = math.tanh %271 : vector<8x128xf32>
    %274 = arith.negf %271 : vector<8x128xf32>
    %275 = math.exp %274 : vector<8x128xf32>
    %cst_168 = arith.constant 1.000000e+00 : f32
    %276 = vector.broadcast %cst_168 : f32 to vector<8x128xf32>
    %277 = arith.addf %276, %275 : vector<8x128xf32>
    %278 = arith.divf %276, %277 : vector<8x128xf32>
    %279 = arith.select %5, %273, %278 : vector<8x128xi1>, vector<8x128xf32>
    %280 = vector.extract_strided_slice %279 {offsets = [0, 0], sizes = [8, 32], strides = [1, 1]} : vector<8x128xf32> to vector<8x32xf32>
    %281 = vector.extract_strided_slice %279 {offsets = [0, 32], sizes = [8, 32], strides = [1, 1]} : vector<8x128xf32> to vector<8x32xf32>
    %282 = vector.extract_strided_slice %279 {offsets = [0, 64], sizes = [8, 32], strides = [1, 1]} : vector<8x128xf32> to vector<8x32xf32>
    %283 = vector.extract_strided_slice %279 {offsets = [0, 96], sizes = [8, 32], strides = [1, 1]} : vector<8x128xf32> to vector<8x32xf32>
    %284 = arith.mulf %281, %272 : vector<8x32xf32>
    %285 = arith.mulf %280, %282 : vector<8x32xf32>
    %286 = arith.addf %284, %285 : vector<8x32xf32>
    %287 = math.tanh %286 : vector<8x32xf32>
    %288 = arith.mulf %283, %287 : vector<8x32xf32>
    %c0_169 = arith.constant 0 : index
    %c0_170 = arith.constant 0 : index
    %289 = vector.load %arg12[%c0_169, %c0_170] : memref<8x32xf32, #tpu.memory_space<vmem>>, vector<8x32xf32>
    tpu.vector_store %arg12[%c0_169, %c0_170], %288 {strides = array<i32>} : memref<8x32xf32, #tpu.memory_space<vmem>>, vector<8x32xf32>,
    %c0_171 = arith.constant 0 : index
    %c0_172 = arith.constant 0 : index
    %290 = vector.load %arg13[%c0_171, %c0_172] : memref<8x32xf32, #tpu.memory_space<vmem>>, vector<8x32xf32>
    tpu.vector_store %arg13[%c0_171, %c0_172], %286 {strides = array<i32>} : memref<8x32xf32, #tpu.memory_space<vmem>>, vector<8x32xf32>,
    %c24_173 = arith.constant 24 : index
    %c0_174 = arith.constant 0 : index
    %291 = vector.load %arg10[%c24_173, %c0_174] : memref<64x128xf32, #tpu.memory_space<vmem>>, vector<8x128xf32>
    %c0_175 = arith.constant 0 : index
    %c0_176 = arith.constant 0 : index
    %292 = vector.load %arg12[%c0_175, %c0_176] : memref<8x32xf32, #tpu.memory_space<vmem>>, vector<8x32xf32>
    %cst_177 = arith.constant dense<0.000000e+00> : vector<8x128xf32>
    %293 = tpu.matmul %292, %221, %cst_177 {dimension_numbers = #tpu.dot_dimension_numbers<[1], [0], [0], [1], [0, 0, 1, 1], [], []>} : vector<8x32xf32>, vector<32x128xf32>, vector<8x128xf32> -> vector<8x128xf32>
    %294 = arith.addf %291, %293 : vector<8x128xf32>
    %c0_178 = arith.constant 0 : index
    %c0_179 = arith.constant 0 : index
    %295 = vector.load %arg13[%c0_178, %c0_179] : memref<8x32xf32, #tpu.memory_space<vmem>>, vector<8x32xf32>
    %296 = math.tanh %294 : vector<8x128xf32>
    %297 = arith.negf %294 : vector<8x128xf32>
    %298 = math.exp %297 : vector<8x128xf32>
    %cst_180 = arith.constant 1.000000e+00 : f32
    %299 = vector.broadcast %cst_180 : f32 to vector<8x128xf32>
    %300 = arith.addf %299, %298 : vector<8x128xf32>
    %301 = arith.divf %299, %300 : vector<8x128xf32>
    %302 = arith.select %5, %296, %301 : vector<8x128xi1>, vector<8x128xf32>
    %303 = vector.extract_strided_slice %302 {offsets = [0, 0], sizes = [8, 32], strides = [1, 1]} : vector<8x128xf32> to vector<8x32xf32>
    %304 = vector.extract_strided_slice %302 {offsets = [0, 32], sizes = [8, 32], strides = [1, 1]} : vector<8x128xf32> to vector<8x32xf32>
    %305 = vector.extract_strided_slice %302 {offsets = [0, 64], sizes = [8, 32], strides = [1, 1]} : vector<8x128xf32> to vector<8x32xf32>
    %306 = vector.extract_strided_slice %302 {offsets = [0, 96], sizes = [8, 32], strides = [1, 1]} : vector<8x128xf32> to vector<8x32xf32>
    %307 = arith.mulf %304, %295 : vector<8x32xf32>
    %308 = arith.mulf %303, %305 : vector<8x32xf32>
    %309 = arith.addf %307, %308 : vector<8x32xf32>
    %310 = math.tanh %309 : vector<8x32xf32>
    %311 = arith.mulf %306, %310 : vector<8x32xf32>
    %c0_181 = arith.constant 0 : index
    %c0_182 = arith.constant 0 : index
    %312 = vector.load %arg12[%c0_181, %c0_182] : memref<8x32xf32, #tpu.memory_space<vmem>>, vector<8x32xf32>
    tpu.vector_store %arg12[%c0_181, %c0_182], %311 {strides = array<i32>} : memref<8x32xf32, #tpu.memory_space<vmem>>, vector<8x32xf32>,
    %c0_183 = arith.constant 0 : index
    %c0_184 = arith.constant 0 : index
    %313 = vector.load %arg13[%c0_183, %c0_184] : memref<8x32xf32, #tpu.memory_space<vmem>>, vector<8x32xf32>
    tpu.vector_store %arg13[%c0_183, %c0_184], %309 {strides = array<i32>} : memref<8x32xf32, #tpu.memory_space<vmem>>, vector<8x32xf32>,
    %c32_185 = arith.constant 32 : index
    %c0_186 = arith.constant 0 : index
    %314 = vector.load %arg10[%c32_185, %c0_186] : memref<64x128xf32, #tpu.memory_space<vmem>>, vector<8x128xf32>
    %c0_187 = arith.constant 0 : index
    %c0_188 = arith.constant 0 : index
    %315 = vector.load %arg12[%c0_187, %c0_188] : memref<8x32xf32, #tpu.memory_space<vmem>>, vector<8x32xf32>
    %cst_189 = arith.constant dense<0.000000e+00> : vector<8x128xf32>
    %316 = tpu.matmul %315, %221, %cst_189 {dimension_numbers = #tpu.dot_dimension_numbers<[1], [0], [0], [1], [0, 0, 1, 1], [], []>} : vector<8x32xf32>, vector<32x128xf32>, vector<8x128xf32> -> vector<8x128xf32>
    %317 = arith.addf %314, %316 : vector<8x128xf32>
    %c0_190 = arith.constant 0 : index
    %c0_191 = arith.constant 0 : index
    %318 = vector.load %arg13[%c0_190, %c0_191] : memref<8x32xf32, #tpu.memory_space<vmem>>, vector<8x32xf32>
    %319 = math.tanh %317 : vector<8x128xf32>
    %320 = arith.negf %317 : vector<8x128xf32>
    %321 = math.exp %320 : vector<8x128xf32>
    %cst_192 = arith.constant 1.000000e+00 : f32
    %322 = vector.broadcast %cst_192 : f32 to vector<8x128xf32>
    %323 = arith.addf %322, %321 : vector<8x128xf32>
    %324 = arith.divf %322, %323 : vector<8x128xf32>
    %325 = arith.select %5, %319, %324 : vector<8x128xi1>, vector<8x128xf32>
    %326 = vector.extract_strided_slice %325 {offsets = [0, 0], sizes = [8, 32], strides = [1, 1]} : vector<8x128xf32> to vector<8x32xf32>
    %327 = vector.extract_strided_slice %325 {offsets = [0, 32], sizes = [8, 32], strides = [1, 1]} : vector<8x128xf32> to vector<8x32xf32>
    %328 = vector.extract_strided_slice %325 {offsets = [0, 64], sizes = [8, 32], strides = [1, 1]} : vector<8x128xf32> to vector<8x32xf32>
    %329 = vector.extract_strided_slice %325 {offsets = [0, 96], sizes = [8, 32], strides = [1, 1]} : vector<8x128xf32> to vector<8x32xf32>
    %330 = arith.mulf %327, %318 : vector<8x32xf32>
    %331 = arith.mulf %326, %328 : vector<8x32xf32>
    %332 = arith.addf %330, %331 : vector<8x32xf32>
    %333 = math.tanh %332 : vector<8x32xf32>
    %334 = arith.mulf %329, %333 : vector<8x32xf32>
    %c0_193 = arith.constant 0 : index
    %c0_194 = arith.constant 0 : index
    %335 = vector.load %arg12[%c0_193, %c0_194] : memref<8x32xf32, #tpu.memory_space<vmem>>, vector<8x32xf32>
    tpu.vector_store %arg12[%c0_193, %c0_194], %334 {strides = array<i32>} : memref<8x32xf32, #tpu.memory_space<vmem>>, vector<8x32xf32>,
    %c0_195 = arith.constant 0 : index
    %c0_196 = arith.constant 0 : index
    %336 = vector.load %arg13[%c0_195, %c0_196] : memref<8x32xf32, #tpu.memory_space<vmem>>, vector<8x32xf32>
    tpu.vector_store %arg13[%c0_195, %c0_196], %332 {strides = array<i32>} : memref<8x32xf32, #tpu.memory_space<vmem>>, vector<8x32xf32>,
    %c40_197 = arith.constant 40 : index
    %c0_198 = arith.constant 0 : index
    %337 = vector.load %arg10[%c40_197, %c0_198] : memref<64x128xf32, #tpu.memory_space<vmem>>, vector<8x128xf32>
    %c0_199 = arith.constant 0 : index
    %c0_200 = arith.constant 0 : index
    %338 = vector.load %arg12[%c0_199, %c0_200] : memref<8x32xf32, #tpu.memory_space<vmem>>, vector<8x32xf32>
    %cst_201 = arith.constant dense<0.000000e+00> : vector<8x128xf32>
    %339 = tpu.matmul %338, %221, %cst_201 {dimension_numbers = #tpu.dot_dimension_numbers<[1], [0], [0], [1], [0, 0, 1, 1], [], []>} : vector<8x32xf32>, vector<32x128xf32>, vector<8x128xf32> -> vector<8x128xf32>
    %340 = arith.addf %337, %339 : vector<8x128xf32>
    %c0_202 = arith.constant 0 : index
    %c0_203 = arith.constant 0 : index
    %341 = vector.load %arg13[%c0_202, %c0_203] : memref<8x32xf32, #tpu.memory_space<vmem>>, vector<8x32xf32>
    %342 = math.tanh %340 : vector<8x128xf32>
    %343 = arith.negf %340 : vector<8x128xf32>
    %344 = math.exp %343 : vector<8x128xf32>
    %cst_204 = arith.constant 1.000000e+00 : f32
    %345 = vector.broadcast %cst_204 : f32 to vector<8x128xf32>
    %346 = arith.addf %345, %344 : vector<8x128xf32>
    %347 = arith.divf %345, %346 : vector<8x128xf32>
    %348 = arith.select %5, %342, %347 : vector<8x128xi1>, vector<8x128xf32>
    %349 = vector.extract_strided_slice %348 {offsets = [0, 0], sizes = [8, 32], strides = [1, 1]} : vector<8x128xf32> to vector<8x32xf32>
    %350 = vector.extract_strided_slice %348 {offsets = [0, 32], sizes = [8, 32], strides = [1, 1]} : vector<8x128xf32> to vector<8x32xf32>
    %351 = vector.extract_strided_slice %348 {offsets = [0, 64], sizes = [8, 32], strides = [1, 1]} : vector<8x128xf32> to vector<8x32xf32>
    %352 = vector.extract_strided_slice %348 {offsets = [0, 96], sizes = [8, 32], strides = [1, 1]} : vector<8x128xf32> to vector<8x32xf32>
    %353 = arith.mulf %350, %341 : vector<8x32xf32>
    %354 = arith.mulf %349, %351 : vector<8x32xf32>
    %355 = arith.addf %353, %354 : vector<8x32xf32>
    %356 = math.tanh %355 : vector<8x32xf32>
    %357 = arith.mulf %352, %356 : vector<8x32xf32>
    %c0_205 = arith.constant 0 : index
    %c0_206 = arith.constant 0 : index
    %358 = vector.load %arg12[%c0_205, %c0_206] : memref<8x32xf32, #tpu.memory_space<vmem>>, vector<8x32xf32>
    tpu.vector_store %arg12[%c0_205, %c0_206], %357 {strides = array<i32>} : memref<8x32xf32, #tpu.memory_space<vmem>>, vector<8x32xf32>,
    %c0_207 = arith.constant 0 : index
    %c0_208 = arith.constant 0 : index
    %359 = vector.load %arg13[%c0_207, %c0_208] : memref<8x32xf32, #tpu.memory_space<vmem>>, vector<8x32xf32>
    tpu.vector_store %arg13[%c0_207, %c0_208], %355 {strides = array<i32>} : memref<8x32xf32, #tpu.memory_space<vmem>>, vector<8x32xf32>,
    %c48_209 = arith.constant 48 : index
    %c0_210 = arith.constant 0 : index
    %360 = vector.load %arg10[%c48_209, %c0_210] : memref<64x128xf32, #tpu.memory_space<vmem>>, vector<8x128xf32>
    %c0_211 = arith.constant 0 : index
    %c0_212 = arith.constant 0 : index
    %361 = vector.load %arg12[%c0_211, %c0_212] : memref<8x32xf32, #tpu.memory_space<vmem>>, vector<8x32xf32>
    %cst_213 = arith.constant dense<0.000000e+00> : vector<8x128xf32>
    %362 = tpu.matmul %361, %221, %cst_213 {dimension_numbers = #tpu.dot_dimension_numbers<[1], [0], [0], [1], [0, 0, 1, 1], [], []>} : vector<8x32xf32>, vector<32x128xf32>, vector<8x128xf32> -> vector<8x128xf32>
    %363 = arith.addf %360, %362 : vector<8x128xf32>
    %c0_214 = arith.constant 0 : index
    %c0_215 = arith.constant 0 : index
    %364 = vector.load %arg13[%c0_214, %c0_215] : memref<8x32xf32, #tpu.memory_space<vmem>>, vector<8x32xf32>
    %365 = math.tanh %363 : vector<8x128xf32>
    %366 = arith.negf %363 : vector<8x128xf32>
    %367 = math.exp %366 : vector<8x128xf32>
    %cst_216 = arith.constant 1.000000e+00 : f32
    %368 = vector.broadcast %cst_216 : f32 to vector<8x128xf32>
    %369 = arith.addf %368, %367 : vector<8x128xf32>
    %370 = arith.divf %368, %369 : vector<8x128xf32>
    %371 = arith.select %5, %365, %370 : vector<8x128xi1>, vector<8x128xf32>
    %372 = vector.extract_strided_slice %371 {offsets = [0, 0], sizes = [8, 32], strides = [1, 1]} : vector<8x128xf32> to vector<8x32xf32>
    %373 = vector.extract_strided_slice %371 {offsets = [0, 32], sizes = [8, 32], strides = [1, 1]} : vector<8x128xf32> to vector<8x32xf32>
    %374 = vector.extract_strided_slice %371 {offsets = [0, 64], sizes = [8, 32], strides = [1, 1]} : vector<8x128xf32> to vector<8x32xf32>
    %375 = vector.extract_strided_slice %371 {offsets = [0, 96], sizes = [8, 32], strides = [1, 1]} : vector<8x128xf32> to vector<8x32xf32>
    %376 = arith.mulf %373, %364 : vector<8x32xf32>
    %377 = arith.mulf %372, %374 : vector<8x32xf32>
    %378 = arith.addf %376, %377 : vector<8x32xf32>
    %379 = math.tanh %378 : vector<8x32xf32>
    %380 = arith.mulf %375, %379 : vector<8x32xf32>
    %c0_217 = arith.constant 0 : index
    %c0_218 = arith.constant 0 : index
    %381 = vector.load %arg12[%c0_217, %c0_218] : memref<8x32xf32, #tpu.memory_space<vmem>>, vector<8x32xf32>
    tpu.vector_store %arg12[%c0_217, %c0_218], %380 {strides = array<i32>} : memref<8x32xf32, #tpu.memory_space<vmem>>, vector<8x32xf32>,
    %c0_219 = arith.constant 0 : index
    %c0_220 = arith.constant 0 : index
    %382 = vector.load %arg13[%c0_219, %c0_220] : memref<8x32xf32, #tpu.memory_space<vmem>>, vector<8x32xf32>
    tpu.vector_store %arg13[%c0_219, %c0_220], %378 {strides = array<i32>} : memref<8x32xf32, #tpu.memory_space<vmem>>, vector<8x32xf32>,
    %c56_221 = arith.constant 56 : index
    %c0_222 = arith.constant 0 : index
    %383 = vector.load %arg10[%c56_221, %c0_222] : memref<64x128xf32, #tpu.memory_space<vmem>>, vector<8x128xf32>
    %c0_223 = arith.constant 0 : index
    %c0_224 = arith.constant 0 : index
    %384 = vector.load %arg12[%c0_223, %c0_224] : memref<8x32xf32, #tpu.memory_space<vmem>>, vector<8x32xf32>
    %cst_225 = arith.constant dense<0.000000e+00> : vector<8x128xf32>
    %385 = tpu.matmul %384, %221, %cst_225 {dimension_numbers = #tpu.dot_dimension_numbers<[1], [0], [0], [1], [0, 0, 1, 1], [], []>} : vector<8x32xf32>, vector<32x128xf32>, vector<8x128xf32> -> vector<8x128xf32>
    %386 = arith.addf %383, %385 : vector<8x128xf32>
    %c0_226 = arith.constant 0 : index
    %c0_227 = arith.constant 0 : index
    %387 = vector.load %arg13[%c0_226, %c0_227] : memref<8x32xf32, #tpu.memory_space<vmem>>, vector<8x32xf32>
    %388 = math.tanh %386 : vector<8x128xf32>
    %389 = arith.negf %386 : vector<8x128xf32>
    %390 = math.exp %389 : vector<8x128xf32>
    %cst_228 = arith.constant 1.000000e+00 : f32
    %391 = vector.broadcast %cst_228 : f32 to vector<8x128xf32>
    %392 = arith.addf %391, %390 : vector<8x128xf32>
    %393 = arith.divf %391, %392 : vector<8x128xf32>
    %394 = arith.select %5, %388, %393 : vector<8x128xi1>, vector<8x128xf32>
    %395 = vector.extract_strided_slice %394 {offsets = [0, 0], sizes = [8, 32], strides = [1, 1]} : vector<8x128xf32> to vector<8x32xf32>
    %396 = vector.extract_strided_slice %394 {offsets = [0, 32], sizes = [8, 32], strides = [1, 1]} : vector<8x128xf32> to vector<8x32xf32>
    %397 = vector.extract_strided_slice %394 {offsets = [0, 64], sizes = [8, 32], strides = [1, 1]} : vector<8x128xf32> to vector<8x32xf32>
    %398 = vector.extract_strided_slice %394 {offsets = [0, 96], sizes = [8, 32], strides = [1, 1]} : vector<8x128xf32> to vector<8x32xf32>
    %399 = arith.mulf %396, %387 : vector<8x32xf32>
    %400 = arith.mulf %395, %397 : vector<8x32xf32>
    %401 = arith.addf %399, %400 : vector<8x32xf32>
    %402 = math.tanh %401 : vector<8x32xf32>
    %403 = arith.mulf %398, %402 : vector<8x32xf32>
    %c0_229 = arith.constant 0 : index
    %c0_230 = arith.constant 0 : index
    %404 = vector.load %arg12[%c0_229, %c0_230] : memref<8x32xf32, #tpu.memory_space<vmem>>, vector<8x32xf32>
    tpu.vector_store %arg12[%c0_229, %c0_230], %403 {strides = array<i32>} : memref<8x32xf32, #tpu.memory_space<vmem>>, vector<8x32xf32>,
    %c0_231 = arith.constant 0 : index
    %c0_232 = arith.constant 0 : index
    %405 = vector.load %arg13[%c0_231, %c0_232] : memref<8x32xf32, #tpu.memory_space<vmem>>, vector<8x32xf32>
    tpu.vector_store %arg13[%c0_231, %c0_232], %401 {strides = array<i32>} : memref<8x32xf32, #tpu.memory_space<vmem>>, vector<8x32xf32>,
    %c0_233 = arith.constant 0 : index
    %c0_234 = arith.constant 0 : index
    %406 = vector.load %arg12[%c0_233, %c0_234] : memref<8x32xf32, #tpu.memory_space<vmem>>, vector<8x32xf32>
    %cst_235 = arith.constant 0.000000e+00 : f32
    %407 = vector.broadcast %cst_235 : f32 to vector<8x32xf32>
    %408 = arith.maximumf %406, %407 : vector<8x32xf32>
    %c0_236 = arith.constant 0 : index
    %c0_237 = arith.constant 0 : index
    %409 = vector.load %arg7[%c0_236, %c0_237] : memref<32x8xf32, #tpu.memory_space<vmem>>, vector<32x8xf32>
    %cst_238 = arith.constant dense<0.000000e+00> : vector<8x8xf32>
    %410 = tpu.matmul %408, %409, %cst_238 {dimension_numbers = #tpu.dot_dimension_numbers<[1], [0], [0], [1], [0, 0, 1, 1], [], []>} : vector<8x32xf32>, vector<32x8xf32>, vector<8x8xf32> -> vector<8x8xf32>
    %c0_239 = arith.constant 0 : index
    %c0_240 = arith.constant 0 : index
    %411 = vector.load %arg8[%c0_239, %c0_240] : memref<1x8xf32, #tpu.memory_space<vmem>>, vector<1x8xf32>
    %412 = vector.broadcast %411 : vector<1x8xf32> to vector<8x8xf32>
    %413 = arith.addf %410, %412 : vector<8x8xf32>
    %c0_241 = arith.constant 0 : index
    %c0_242 = arith.constant 0 : index
    %414 = vector.load %arg9[%c0_241, %c0_242] : memref<8x8xf32, #tpu.memory_space<vmem>>, vector<8x8xf32>
    tpu.vector_store %arg9[%c0_241, %c0_242], %413 {strides = array<i32>} : memref<8x8xf32, #tpu.memory_space<vmem>>, vector<8x8xf32>,
    return
  }
}

</mosaic_0001>

<bundles_post_ra>
// kernel: lstm_net_forward.1
= control target key start
LH: loop header
LB: loop body
LE: loop exit
PB: predicated region body
PF: predicated region fallthrough
CT: control target
= control target key end

     0   :  { %vm78_vm0 = vcmask 1043456   ;;  %vm53_vm1 = vcmask 31744   ;;  %v2833_v0 = vmov 0.0   ;;  %vm2834_vm2 = vmmov 0   ;;  %s2836_s23 = smov 32   ;;  %s2837_s24 = smov 96   ;;  %s3416_s1 = inlined_call_operand.vmem [shape: f32[4,128], index: 1, kind: input, shape index: {}]   ;;  %s3417_s3 = inlined_call_operand.vmem [shape: f32[32,128], index: 3, kind: input, shape index: {}]   ;;  %s3418_s0 = inlined_call_operand.vmem [shape: f32[64,4], index: 0, kind: input, shape index: {}]   ;;  %s3419_s2 = inlined_call_operand.vmem [shape: f32[1,128], index: 2, kind: input, shape index: {}]   ;;  %s3420_s4 = inlined_call_operand.vmem [shape: f32[32,128], index: 4, kind: input, shape index: {}]   ;;  %s3421_s6 = inlined_call_operand.vmem [shape: f32[32,128], index: 6, kind: input, shape index: {}]   ;;  %s3422_s5 = inlined_call_operand.vmem [shape: f32[1,128], index: 5, kind: input, shape index: {}]   ;;  %s3423_s7 = inlined_call_operand.vmem [shape: f32[32,8], index: 7, kind: input, shape index: {}]   ;;  %s3424_s8 = inlined_call_operand.vmem [shape: f32[1,8], index: 8, kind: input, shape index: {}]   ;;  %s3425_s9 = inlined_call_operand.vmem [shape: f32[8,8], index: 9, kind: output, shape index: {}]  }
   0x1   :  { %2493 = vmatprep.subr.mxu1 %v2833_v0  ;;  %v45_v1 = vld [vmem:[%s3416_s1] sm:$0xf]  ;;  %v2895_v2 = vld [vmem:[%s3417_s3 + $0x18] sm:$0xff]  ;;  %2501 = vmatprep.mubr.msk.f32.mxu1 %vm2834_vm2, %v2833_v0  ;;  %vm195_vm3 = vcmask 261120   ;;  %v38_v4 = vld [vmem:[%s3418_s0 + $0x8] sm:$0xff]  ;;  %v32_v19 = vlaneseq  ;;  %vm2314_vm7 = vcmask 64512  }
   0x2   :  { %v37_v3 = vld [vmem:[%s3418_s0] sm:$0xff]  ;;  %2479 = vmatprep.subr.msk.mxu0 %vm78_vm0, %v45_v1  ;;  %2494 = vmatpush3.msra.mxu1 %v2895_v2  ;;  %v2910_v5 = vld [vmem:[%s3417_s3 + $0x10] sm:$0xff]  ;;  %196 = vst.msk [vmem:[#allocation4] sm:$0xff] %vm195_vm3, %v2833_v0  ;;  %197 = vst.msk [vmem:[#allocation5] sm:$0xff] %vm195_vm3, %v2833_v0 }
   0x3   :  { %2480 = vmatpush3.msk.msra.mxu0 %vm78_vm0, %v45_v1  ;;  %2481 = vmatprep.mubr.msk.f32.mxu0 %vm53_vm1, %v37_v3  ;;  %v2923_v6 = vld [vmem:[%s3417_s3 + $0x8] sm:$0xff]  ;;  %v2931_v7 = vld [vmem:[%s3417_s3] sm:$0xff]  ;;  %v33_v20 = vand.u32 127, %v32_v19  ;;  %v39_v56 = vld [vmem:[%s3418_s0 + $0x10] sm:$0xff] }
   0x4   :  { %2495 = vmatprep.subr.mxu1 %v2833_v0  ;;  %2482 = vmatmul.mubr.msk.f32.vlgmr.msra.gmra.mxu0 %vm53_vm1, %v38_v4  ;;  %v2959_v10 = vld [vmem:[%s3419_s2] ss:$0 sm:$0xff]  ;;  %s2835_s2 = smov 64   ;;  %v40_v57 = vld [vmem:[%s3418_s0 + $0x18] sm:$0xff]  ;;  %v42_v59 = vld [vmem:[%s3418_s0 + $0x28] sm:$0xff] }
   0x5   :  { %2496 = vmatpush3.msra.mxu1 %v2910_v5  ;;  %2515 = vmatprep.subr.mxu0 %v2833_v0  ;;  %vm34_vm4 = vcmp.ge.s32.totalorder %v33_v20, 64  ;;  %vm35_vm5 = vcmp.lt.s32.totalorder %v33_v20, 96  ;;  %v41_v58 = vld [vmem:[%s3418_s0 + $0x20] sm:$0xff]  ;;  %v43_v60 = vld [vmem:[%s3418_s0 + $0x30] sm:$0xff]  ;;  %v44_v61 = vld [vmem:[%s3418_s0 + $0x38] sm:$0xff] }
   0x6   :  { %2497 = vmatprep.subr.mxu1 %v2833_v0  ;;  %2516 = vmatpush3.msra.mxu0 %v2895_v2  ;;  %vm2962_vm6 = vmand %vm34_vm4, %vm35_vm5  ;;  %v2233_v21 = vld [vmem:[%s3423_s7 + $0x18] sm:$0xff] }
   0x7   :  { %2498 = vmatpush3.msra.mxu1 %v2923_v6  ;;  %2517 = vmatprep.subr.mxu0 %v2833_v0 }
   0x8   :  { %2499 = vmatprep.subr.mxu1 %v2833_v0  ;;  %2518 = vmatpush3.msra.mxu0 %v2910_v5 }
   0x9   :  { %2500 = vmatpush3.msra.mxu1 %v2931_v7  ;;  %v203_v8 = vld [vmem:[#allocation4] sm:$0xff]  ;;  %2519 = vmatprep.subr.mxu0 %v2833_v0  ;;  %v278_v25 = vld [vmem:[#allocation5] sm:$0xff] }
   0xa   :  { %2502 = vmatmul.mubr.msk.f32.vlgmr.msra.gmra.mxu1 %vm195_vm3, %v203_v8  ;;  %2504 = vmatprep.subr.mxu1 %v2833_v0 }
   0xb   :  { %2505 = vmatpush3.msra.mxu1 %v2895_v2  ;;  %2512 = vmatprep.mubr.msk.f32.mxu1 %vm2834_vm2, %v2833_v0 }
   0xc   :  { %2506 = vmatprep.subr.mxu1 %v2833_v0  ;;  %2520 = vmatpush3.msra.mxu0 %v2923_v6 }
   0xd   :  { %2507 = vmatpush3.msra.mxu1 %v2910_v5  ;;  %2521 = vmatprep.subr.mxu0 %v2833_v0 }
   0xe   :  { %2508 = vmatprep.subr.mxu1 %v2833_v0  ;;  %2522 = vmatpush3.msra.mxu0 %v2931_v7 }
   0xf   :  { %2509 = vmatpush3.msra.mxu1 %v2923_v6  ;;  %2537 = vmatprep.subr.mxu0 %v2833_v0 }
  0x10   :  { %2510 = vmatprep.subr.mxu1 %v2833_v0  ;;  %2484 = vmatprep.mubr.msk.f32.mxu0 %vm53_vm1, %v39_v56 }
  0x11   :  { %2511 = vmatpush3.msra.mxu1 %v2931_v7  ;;  %2485 = vmatmul.mubr.msk.f32.gmra.mxu0 %vm53_vm1, %v40_v57 }
  0x12   :  { %2526 = vmatprep.subr.mxu1 %v2833_v0  ;;  %2487 = vmatprep.mubr.msk.f32.mxu0 %vm53_vm1, %v41_v58 }
  0x15   :  { %2488 = vmatmul.mubr.msk.f32.gmra.mxu0 %vm53_vm1, %v42_v59 }
  0x16   :  { %2490 = vmatprep.mubr.msk.f32.mxu0 %vm53_vm1, %v43_v60 }
  0x19   :  { %2491 = vmatmul.mubr.msk.f32.gmra.mxu0 %vm53_vm1, %v44_v61 }
  0x1a   :  { %2523 = vmatprep.mubr.msk.f32.mxu0 %vm2834_vm2, %v2833_v0 }
  0xc4   :  { %v2483_v9 = vpop.f32.mrf.mxu0 }
  0xc5   :  { %v154_v39 = vadd.f32 %v2483_v9, %v2959_v10 }
  0xc6   :  { %v148_v11 = vpop.f32.mrf.mxu0 }
  0xc7   :  { %v149_v12 = vadd.f32 %v2959_v10, %v148_v11 }
  0xca   :  { %v273_v13 = vpop.f32.mrf.mxu1 }
  0xcb   :  { %v277_v14 = vadd.f32 %v273_v13, %v149_v12 }
  0xcc   :  { %v2503_v15 = vpop.f32.mrf.mxu1 }
  0xcd   :  { %v2331_v16 = vmul.f32 -1.442695, %v277_v14 }
  0xcf   :  { %2705 = vpow2.f32 %v2331_v16 }
  0xd0   :  { %2707 = vtanh.f32 %v277_v14 }
  0xd1   :  { %v2486_v9 = vpop.f32.mrf.mxu0 }
  0xd3   :  { %v158_v11 = vpop.f32.mrf.mxu0 }
  0xd4   :  { %v159_v16 = vadd.f32 %v2959_v10, %v158_v11 }
  0xd5   :  { %v3038_v12 = vpop.f32.mrf.mxu0 }
  0xd7   :  { %v3040_v13 = vpop.f32.mrf.mxu0 }
  0xd9   :  { %v3042_v14 = vpop.f32.mrf.mxu0 }
  0xdb   :  { %v3044_v15 = vpop.f32.mrf.mxu0 }
  0xdc   :  { %v2706_v17 = vpop.eup %2705 }
  0xdd   :  { %v283_v18 = vadd.f32 1.0, %v2706_v17  ;;  %v2708_v22 = vpop.eup %2707 }
  0xdf   :  { %2709 = vrcp.f32 %v283_v18 }
  0xec   :  { %v2710_v23 = vpop.eup %2709 }
  0xed   :  { %v286_v24 = vsel %vm2962_vm6, %v2708_v22, %v2710_v23 }
  0xee   :  { %293 = vrot.lane.b32.xlu0 %v286_v24, %s2835_s2 }
  0xf2   :  { %288 = vrot.lane.b32.xlu0 %v278_v25, %s2836_s23 }
 0x160   :  { %v294_v26 = vpop.permute.xlu0 %293 }
 0x161   :  { %v296_v27 = vmul.f32 %v294_v26, %v286_v24 }
 0x163   :  { %298 = vrot.lane.b32.xlu1 %v296_v27, %s2836_s23 }
 0x164   :  { %v289_v28 = vpop.permute.xlu0 %288 }
 0x165   :  { %v291_v29 = vmul.f32 %v289_v28, %v286_v24 }
 0x1d5   :  { %v299_v30 = vpop.permute.xlu1 %298 }
 0x1d6   :  { %v301_v31 = vadd.f32 %v299_v30, %v291_v29 }
 0x1d8   :  { %2711 = vtanh.f32 %v301_v31 }
 0x1e5   :  { %v2712_v32 = vpop.eup %2711 }
 0x1e6   :  { %304 = vrot.lane.b32.xlu1 %v2712_v32, %s2835_s2 }
 0x1ea   :  { %314 = vrot.lane.b32.xlu1 %v301_v31, %s2837_s24 }
 0x258   :  { %v305_v33 = vpop.permute.xlu1 %304 }
 0x259   :  { %v307_v34 = vmul.f32 %v305_v33, %v286_v24 }
 0x25b   :  { %309 = vrot.lane.b32.xlu0 %v307_v34, %s2836_s23 }
 0x25c   :  { %v315_v35 = vpop.permute.xlu1 %314 }
 0x25d   :  { %317 = vst.msk [vmem:[#allocation5] sm:$0xff] %vm195_vm3, %v315_v35 }
 0x264   :  { %v395_v36 = vld [vmem:[#allocation5] sm:$0xff] }
 0x265   :  { %405 = vrot.lane.b32.xlu1 %v395_v36, %s2836_s23 }
 0x2cd   :  { %v310_v37 = vpop.permute.xlu0 %309 }
 0x2ce   :  { %312 = vst.msk [vmem:[#allocation4] sm:$0xff] %vm195_vm3, %v310_v37  ;;  %318 = vst.msk [vmem:[#allocation3] sm:$0xff] %vm195_vm3, %v310_v37 }
 0x2d5   :  { %v320_v38 = vld [vmem:[#allocation4] sm:$0xff] }
 0x2d6   :  { %2513 = vmatmul.mubr.msk.f32.vlgmr.msra.gmra.mxu1 %vm195_vm3, %v320_v38 }
 0x2d7   :  { %2527 = vmatpush3.msra.mxu1 %v2895_v2  ;;  %2534 = vmatprep.mubr.msk.f32.mxu1 %vm2834_vm2, %v2833_v0  ;;  %v406_v51 = vpop.permute.xlu1 %405 }
 0x2d8   :  { %2528 = vmatprep.subr.mxu1 %v2833_v0 }
 0x2d9   :  { %2529 = vmatpush3.msra.mxu1 %v2910_v5 }
 0x2da   :  { %2530 = vmatprep.subr.mxu1 %v2833_v0 }
 0x2db   :  { %2531 = vmatpush3.msra.mxu1 %v2923_v6 }
 0x2dc   :  { %2532 = vmatprep.subr.mxu1 %v2833_v0 }
 0x2dd   :  { %2533 = vmatpush3.msra.mxu1 %v2931_v7 }
 0x2de   :  { %2548 = vmatprep.subr.mxu1 %v2833_v0 }
 0x396   :  { %v390_v40 = vpop.f32.mrf.mxu1 }
 0x397   :  { %v394_v41 = vadd.f32 %v390_v40, %v154_v39  ;;  %v164_v40 = vadd.f32 %v2486_v9, %v2959_v10 }
 0x398   :  { %v2514_v42 = vpop.f32.mrf.mxu1 }
 0x399   :  { %v2333_v43 = vmul.f32 -1.442695, %v394_v41 }
 0x39b   :  { %2713 = vpow2.f32 %v2333_v43 }
 0x39c   :  { %2715 = vtanh.f32 %v394_v41 }
 0x3a8   :  { %v2714_v44 = vpop.eup %2713 }
 0x3a9   :  { %v400_v45 = vadd.f32 1.0, %v2714_v44  ;;  %v2716_v46 = vpop.eup %2715 }
 0x3ab   :  { %2717 = vrcp.f32 %v400_v45 }
 0x3b8   :  { %v2718_v47 = vpop.eup %2717 }
 0x3b9   :  { %v403_v48 = vsel %vm2962_vm6, %v2716_v46, %v2718_v47 }
 0x3ba   :  { %410 = vrot.lane.b32.xlu0 %v403_v48, %s2835_s2  ;;  %v408_v52 = vmul.f32 %v406_v51, %v403_v48 }
 0x42c   :  { %v411_v49 = vpop.permute.xlu0 %410 }
 0x42d   :  { %v413_v50 = vmul.f32 %v411_v49, %v403_v48 }
 0x42f   :  { %415 = vrot.lane.b32.xlu0 %v413_v50, %s2836_s23 }
 0x4a1   :  { %v416_v53 = vpop.permute.xlu0 %415 }
 0x4a2   :  { %v418_v54 = vadd.f32 %v416_v53, %v408_v52 }
 0x4a4   :  { %2719 = vtanh.f32 %v418_v54 }
 0x4b1   :  { %v2720_v55 = vpop.eup %2719 }
 0x4b2   :  { %421 = vrot.lane.b32.xlu1 %v2720_v55, %s2835_s2 }
 0x4b6   :  { %431 = vrot.lane.b32.xlu1 %v418_v54, %s2837_s24 }
 0x524   :  { %v422_v62 = vpop.permute.xlu1 %421 }
 0x525   :  { %v424_v63 = vmul.f32 %v422_v62, %v403_v48 }
 0x527   :  { %426 = vrot.lane.b32.xlu0 %v424_v63, %s2836_s23  ;;  %v169_v63 = vadd.f32 %v2959_v10, %v3040_v13 }
 0x528   :  { %v432_v1 = vpop.permute.xlu1 %431 }
 0x529   :  { %434 = vst.msk [vmem:[#allocation5] sm:$0xff] %vm195_vm3, %v432_v1 }
 0x530   :  { %v512_v3 = vld [vmem:[#allocation5] sm:$0xff] }
 0x531   :  { %522 = vrot.lane.b32.xlu1 %v512_v3, %s2836_s23 }
 0x599   :  { %v427_v4 = vpop.permute.xlu0 %426 }
 0x59a   :  { %429 = vst.msk [vmem:[#allocation4] sm:$0xff] %vm195_vm3, %v427_v4  ;;  %435 = vst.msk [vmem:[#allocation3 + $0x8] sm:$0xff] %vm195_vm3, %v427_v4 }
 0x5a1   :  { %v437_v8 = vld [vmem:[#allocation4] sm:$0xff] }
 0x5a2   :  { %2524 = vmatmul.mubr.msk.f32.vlgmr.msra.gmra.mxu0 %vm195_vm3, %v437_v8 }
 0x5a3   :  { %2538 = vmatpush3.msra.mxu0 %v2895_v2  ;;  %2545 = vmatprep.mubr.msk.f32.mxu0 %vm2834_vm2, %v2833_v0  ;;  %v523_v29 = vpop.permute.xlu1 %522 }
 0x5a4   :  { %2539 = vmatprep.subr.mxu0 %v2833_v0 }
 0x5a5   :  { %2540 = vmatpush3.msra.mxu0 %v2910_v5 }
 0x5a6   :  { %2541 = vmatprep.subr.mxu0 %v2833_v0 }
 0x5a7   :  { %2542 = vmatpush3.msra.mxu0 %v2923_v6 }
 0x5a8   :  { %2543 = vmatprep.subr.mxu0 %v2833_v0 }
 0x5a9   :  { %2544 = vmatpush3.msra.mxu0 %v2931_v7 }
 0x5aa   :  { %2559 = vmatprep.subr.mxu0 %v2833_v0 }
 0x662   :  { %v507_v17 = vpop.f32.mrf.mxu0 }
 0x663   :  { %v511_v18 = vadd.f32 %v507_v17, %v159_v16 }
 0x664   :  { %v2525_v19 = vpop.f32.mrf.mxu0 }
 0x665   :  { %v2335_v20 = vmul.f32 -1.442695, %v511_v18 }
 0x667   :  { %2721 = vpow2.f32 %v2335_v20 }
 0x668   :  { %2723 = vtanh.f32 %v511_v18 }
 0x674   :  { %v2722_v22 = vpop.eup %2721 }
 0x675   :  { %v517_v23 = vadd.f32 1.0, %v2722_v22  ;;  %v2724_v24 = vpop.eup %2723 }
 0x677   :  { %2725 = vrcp.f32 %v517_v23 }
 0x684   :  { %v2726_v25 = vpop.eup %2725 }
 0x685   :  { %v520_v26 = vsel %vm2962_vm6, %v2724_v24, %v2726_v25 }
 0x686   :  { %527 = vrot.lane.b32.xlu0 %v520_v26, %s2835_s2  ;;  %v525_v30 = vmul.f32 %v523_v29, %v520_v26 }
 0x6f8   :  { %v528_v27 = vpop.permute.xlu0 %527 }
 0x6f9   :  { %v530_v28 = vmul.f32 %v528_v27, %v520_v26 }
 0x6fb   :  { %532 = vrot.lane.b32.xlu0 %v530_v28, %s2836_s23 }
 0x76d   :  { %v533_v31 = vpop.permute.xlu0 %532 }
 0x76e   :  { %v535_v32 = vadd.f32 %v533_v31, %v525_v30 }
 0x770   :  { %2727 = vtanh.f32 %v535_v32 }
 0x77d   :  { %v2728_v33 = vpop.eup %2727 }
 0x77e   :  { %538 = vrot.lane.b32.xlu1 %v2728_v33, %s2835_s2 }
 0x782   :  { %548 = vrot.lane.b32.xlu1 %v535_v32, %s2837_s24 }
 0x7f0   :  { %v539_v34 = vpop.permute.xlu1 %538 }
 0x7f1   :  { %v541_v35 = vmul.f32 %v539_v34, %v520_v26 }
 0x7f3   :  { %543 = vrot.lane.b32.xlu0 %v541_v35, %s2836_s23 }
 0x7f4   :  { %v549_v36 = vpop.permute.xlu1 %548 }
 0x7f5   :  { %551 = vst.msk [vmem:[#allocation5] sm:$0xff] %vm195_vm3, %v549_v36 }
 0x7fc   :  { %v629_v37 = vld [vmem:[#allocation5] sm:$0xff] }
 0x7fd   :  { %639 = vrot.lane.b32.xlu1 %v629_v37, %s2836_s23 }
 0x865   :  { %v544_v38 = vpop.permute.xlu0 %543 }
 0x866   :  { %546 = vst.msk [vmem:[#allocation4] sm:$0xff] %vm195_vm3, %v544_v38  ;;  %552 = vst.msk [vmem:[#allocation3 + $0x10] sm:$0xff] %vm195_vm3, %v544_v38 }
 0x86d   :  { %v554_v39 = vld [vmem:[#allocation4] sm:$0xff] }
 0x86e   :  { %2535 = vmatmul.mubr.msk.f32.vlgmr.msra.gmra.mxu1 %vm195_vm3, %v554_v39 }
 0x86f   :  { %2549 = vmatpush3.msra.mxu1 %v2895_v2  ;;  %2556 = vmatprep.mubr.msk.f32.mxu1 %vm2834_vm2, %v2833_v0  ;;  %v640_v52 = vpop.permute.xlu1 %639 }
 0x870   :  { %2550 = vmatprep.subr.mxu1 %v2833_v0 }
 0x871   :  { %2551 = vmatpush3.msra.mxu1 %v2910_v5 }
 0x872   :  { %2552 = vmatprep.subr.mxu1 %v2833_v0 }
 0x873   :  { %2553 = vmatpush3.msra.mxu1 %v2923_v6 }
 0x874   :  { %2554 = vmatprep.subr.mxu1 %v2833_v0 }
 0x875   :  { %2555 = vmatpush3.msra.mxu1 %v2931_v7 }
 0x876   :  { %2570 = vmatprep.subr.mxu1 %v2833_v0 }
 0x92e   :  { %v624_v41 = vpop.f32.mrf.mxu1 }
 0x92f   :  { %v628_v42 = vadd.f32 %v624_v41, %v164_v40 }
 0x930   :  { %v2536_v43 = vpop.f32.mrf.mxu1 }
 0x931   :  { %v2337_v44 = vmul.f32 -1.442695, %v628_v42 }
 0x933   :  { %2729 = vpow2.f32 %v2337_v44  ;;  %v1149_v44 = vld [vmem:[%s3420_s4 + $0x18] sm:$0xff] }
 0x934   :  { %2731 = vtanh.f32 %v628_v42 }
 0x940   :  { %v2730_v45 = vpop.eup %2729 }
 0x941   :  { %v634_v46 = vadd.f32 1.0, %v2730_v45  ;;  %v2732_v47 = vpop.eup %2731 }
 0x943   :  { %2733 = vrcp.f32 %v634_v46 }
 0x950   :  { %v2734_v48 = vpop.eup %2733 }
 0x951   :  { %v637_v49 = vsel %vm2962_vm6, %v2732_v47, %v2734_v48 }
 0x952   :  { %644 = vrot.lane.b32.xlu0 %v637_v49, %s2835_s2  ;;  %v642_v53 = vmul.f32 %v640_v52, %v637_v49  ;;  %v1138_v52 = vld [vmem:[#allocation3] sm:$0xff] }
 0x9c4   :  { %v645_v50 = vpop.permute.xlu0 %644 }
 0x9c5   :  { %v647_v51 = vmul.f32 %v645_v50, %v637_v49 }
 0x9c7   :  { %649 = vrot.lane.b32.xlu0 %v647_v51, %s2836_s23  ;;  %v1148_v51 = vld [vmem:[%s3420_s4 + $0x10] sm:$0xff] }
 0xa39   :  { %v650_v54 = vpop.permute.xlu0 %649 }
 0xa3a   :  { %v652_v55 = vadd.f32 %v650_v54, %v642_v53  ;;  %v1147_v53 = vld [vmem:[%s3420_s4 + $0x8] sm:$0xff]  ;;  %v1146_v54 = vld [vmem:[%s3420_s4] sm:$0xff] }
 0xa3c   :  { %2735 = vtanh.f32 %v652_v55 }
 0xa49   :  { %v2736_v56 = vpop.eup %2735 }
 0xa4a   :  { %655 = vrot.lane.b32.xlu1 %v2736_v56, %s2835_s2  ;;  %v1140_v56 = vld [vmem:[#allocation3 + $0x10] sm:$0xff] }
 0xa4e   :  { %665 = vrot.lane.b32.xlu1 %v652_v55, %s2837_s24  ;;  %v1139_v55 = vld [vmem:[#allocation3 + $0x8] sm:$0xff] }
 0xabc   :  { %v656_v57 = vpop.permute.xlu1 %655 }
 0xabd   :  { %v658_v58 = vmul.f32 %v656_v57, %v637_v49 }
 0xabf   :  { %660 = vrot.lane.b32.xlu0 %v658_v58, %s2836_s23 }
 0xac0   :  { %v666_v59 = vpop.permute.xlu1 %665 }
 0xac1   :  { %668 = vst.msk [vmem:[#allocation5] sm:$0xff] %vm195_vm3, %v666_v59 }
 0xac8   :  { %v746_v60 = vld [vmem:[#allocation5] sm:$0xff] }
 0xac9   :  { %756 = vrot.lane.b32.xlu1 %v746_v60, %s2836_s23  ;;  %v179_v60 = vadd.f32 %v2959_v10, %v3044_v15 }
 0xb31   :  { %v661_v61 = vpop.permute.xlu0 %660 }
 0xb32   :  { %663 = vst.msk [vmem:[#allocation4] sm:$0xff] %vm195_vm3, %v661_v61  ;;  %669 = vst.msk [vmem:[#allocation3 + $0x18] sm:$0xff] %vm195_vm3, %v661_v61 }
 0xb39   :  { %v671_v62 = vld [vmem:[#allocation4] sm:$0xff]  ;;  %v1141_v57 = vld [vmem:[#allocation3 + $0x18] sm:$0xff] }
 0xb3a   :  { %2546 = vmatmul.mubr.msk.f32.vlgmr.msra.gmra.mxu0 %vm195_vm3, %v671_v62 }
 0xb3b   :  { %2560 = vmatpush3.msra.mxu0 %v2895_v2  ;;  %2567 = vmatprep.mubr.msk.f32.mxu0 %vm2834_vm2, %v2833_v0  ;;  %v757_v13 = vpop.permute.xlu1 %756 }
 0xb3c   :  { %2561 = vmatprep.subr.mxu0 %v2833_v0 }
 0xb3d   :  { %2562 = vmatpush3.msra.mxu0 %v2910_v5 }
 0xb3e   :  { %2563 = vmatprep.subr.mxu0 %v2833_v0 }
 0xb3f   :  { %2564 = vmatpush3.msra.mxu0 %v2923_v6 }
 0xb40   :  { %2565 = vmatprep.subr.mxu0 %v2833_v0 }
 0xb41   :  { %2566 = vmatpush3.msra.mxu0 %v2931_v7 }
 0xb42   :  { %2581 = vmatprep.subr.mxu0 %v1149_v44 }
 0xbfa   :  { %v741_v1 = vpop.f32.mrf.mxu0 }
 0xbfb   :  { %v745_v3 = vadd.f32 %v741_v1, %v169_v63 }
 0xbfc   :  { %v2547_v4 = vpop.f32.mrf.mxu0 }
 0xbfd   :  { %v2339_v8 = vmul.f32 -1.442695, %v745_v3 }
 0xbff   :  { %2737 = vpow2.f32 %v2339_v8 }
 0xc00   :  { %2739 = vtanh.f32 %v745_v3 }
 0xc0c   :  { %v2738_v9 = vpop.eup %2737 }
 0xc0d   :  { %v751_v11 = vadd.f32 1.0, %v2738_v9  ;;  %v2740_v16 = vpop.eup %2739 }
 0xc0f   :  { %2741 = vrcp.f32 %v751_v11 }
 0xc1c   :  { %v2742_v17 = vpop.eup %2741 }
 0xc1d   :  { %v754_v18 = vsel %vm2962_vm6, %v2740_v16, %v2742_v17 }
 0xc1e   :  { %761 = vrot.lane.b32.xlu0 %v754_v18, %s2835_s2  ;;  %v759_v22 = vmul.f32 %v757_v13, %v754_v18 }
 0xc90   :  { %v762_v19 = vpop.permute.xlu0 %761 }
 0xc91   :  { %v764_v20 = vmul.f32 %v762_v19, %v754_v18 }
 0xc93   :  { %766 = vrot.lane.b32.xlu0 %v764_v20, %s2836_s23 }
 0xd05   :  { %v767_v23 = vpop.permute.xlu0 %766 }
 0xd06   :  { %v769_v24 = vadd.f32 %v767_v23, %v759_v22 }
 0xd08   :  { %2743 = vtanh.f32 %v769_v24 }
 0xd15   :  { %v2744_v25 = vpop.eup %2743 }
 0xd16   :  { %772 = vrot.lane.b32.xlu1 %v2744_v25, %s2835_s2 }
 0xd1a   :  { %782 = vrot.lane.b32.xlu1 %v769_v24, %s2837_s24 }
 0xd88   :  { %v773_v26 = vpop.permute.xlu1 %772 }
 0xd89   :  { %v775_v27 = vmul.f32 %v773_v26, %v754_v18 }
 0xd8b   :  { %777 = vrot.lane.b32.xlu0 %v775_v27, %s2836_s23 }
 0xd8c   :  { %v783_v28 = vpop.permute.xlu1 %782 }
 0xd8d   :  { %785 = vst.msk [vmem:[#allocation5] sm:$0xff] %vm195_vm3, %v783_v28 }
 0xd94   :  { %v863_v29 = vld [vmem:[#allocation5] sm:$0xff] }
 0xd95   :  { %873 = vrot.lane.b32.xlu1 %v863_v29, %s2836_s23  ;;  %v184_v29 = vadd.f32 %v3042_v14, %v2959_v10 }
 0xdfd   :  { %v778_v30 = vpop.permute.xlu0 %777 }
 0xdfe   :  { %780 = vst.msk [vmem:[#allocation4] sm:$0xff] %vm195_vm3, %v778_v30  ;;  %786 = vst.msk [vmem:[#allocation3 + $0x20] sm:$0xff] %vm195_vm3, %v778_v30 }
 0xe05   :  { %v788_v31 = vld [vmem:[#allocation4] sm:$0xff] }
 0xe06   :  { %2557 = vmatmul.mubr.msk.f32.vlgmr.msra.gmra.mxu1 %vm195_vm3, %v788_v31  ;;  %v1142_v58 = vld [vmem:[#allocation3 + $0x20] sm:$0xff] }
 0xe07   :  { %2571 = vmatpush3.msra.mxu1 %v2895_v2  ;;  %2578 = vmatprep.mubr.msk.f32.mxu1 %vm2834_vm2, %v2833_v0  ;;  %v174_v2 = vadd.f32 %v3038_v12, %v2959_v10  ;;  %v874_v12 = vpop.permute.xlu1 %873 }
 0xe08   :  { %2572 = vmatprep.subr.mxu1 %v2833_v0 }
 0xe09   :  { %2573 = vmatpush3.msra.mxu1 %v2910_v5 }
 0xe0a   :  { %2574 = vmatprep.subr.mxu1 %v2833_v0 }
 0xe0b   :  { %2575 = vmatpush3.msra.mxu1 %v2923_v6 }
 0xe0c   :  { %2576 = vmatprep.subr.mxu1 %v2833_v0 }
 0xe0d   :  { %2577 = vmatpush3.msra.mxu1 %v2931_v7 }
 0xe0e   :  { %2601 = vmatprep.subr.mxu1 %v2833_v0 }
 0xec6   :  { %v858_v32 = vpop.f32.mrf.mxu1 }
 0xec7   :  { %v862_v33 = vadd.f32 %v858_v32, %v174_v2 }
 0xec8   :  { %v2558_v34 = vpop.f32.mrf.mxu1 }
 0xec9   :  { %v2341_v35 = vmul.f32 -1.442695, %v862_v33 }
 0xecb   :  { %2745 = vpow2.f32 %v2341_v35 }
 0xecc   :  { %2747 = vtanh.f32 %v862_v33 }
 0xed8   :  { %v2746_v36 = vpop.eup %2745 }
 0xed9   :  { %v868_v5 = vadd.f32 1.0, %v2746_v36  ;;  %v2748_v37 = vpop.eup %2747 }
 0xedb   :  { %2749 = vrcp.f32 %v868_v5 }
 0xee8   :  { %v2750_v6 = vpop.eup %2749 }
 0xee9   :  { %v871_v38 = vsel %vm2962_vm6, %v2748_v37, %v2750_v6 }
 0xeea   :  { %878 = vrot.lane.b32.xlu0 %v871_v38, %s2835_s2  ;;  %v876_v40 = vmul.f32 %v874_v12, %v871_v38  ;;  %v3176_v12 = vld [vmem:[%s3421_s6 + $0x18] sm:$0xff] }
 0xf5c   :  { %v879_v7 = vpop.permute.xlu0 %878 }
 0xf5d   :  { %v881_v39 = vmul.f32 %v879_v7, %v871_v38 }
 0xf5f   :  { %883 = vrot.lane.b32.xlu0 %v881_v39, %s2836_s23 }
 0xfd1   :  { %v884_v41 = vpop.permute.xlu0 %883 }
 0xfd2   :  { %v886_v42 = vadd.f32 %v884_v41, %v876_v40  ;;  %v3181_v40 = vld [vmem:[%s3421_s6 + $0x10] sm:$0xff]  ;;  %v3189_v41 = vld [vmem:[%s3421_s6 + $0x8] sm:$0xff] }
 0xfd4   :  { %2751 = vtanh.f32 %v886_v42 }
 0xfe1   :  { %v2752_v43 = vpop.eup %2751 }
 0xfe2   :  { %889 = vrot.lane.b32.xlu1 %v2752_v43, %s2835_s2 }
 0xfe6   :  { %899 = vrot.lane.b32.xlu1 %v886_v42, %s2837_s24  ;;  %v3202_v42 = vld [vmem:[%s3421_s6] sm:$0xff] }
0x1054   :  { %v890_v45 = vpop.permute.xlu1 %889 }
0x1055   :  { %v892_v46 = vmul.f32 %v890_v45, %v871_v38 }
0x1057   :  { %894 = vrot.lane.b32.xlu0 %v892_v46, %s2836_s23 }
0x1058   :  { %v900_v47 = vpop.permute.xlu1 %899 }
0x1059   :  { %902 = vst.msk [vmem:[#allocation5] sm:$0xff] %vm195_vm3, %v900_v47 }
0x1060   :  { %v980_v48 = vld [vmem:[#allocation5] sm:$0xff] }
0x1061   :  { %990 = vrot.lane.b32.xlu1 %v980_v48, %s2836_s23 }
0x10c9   :  { %v895_v49 = vpop.permute.xlu0 %894 }
0x10ca   :  { %897 = vst.msk [vmem:[#allocation4] sm:$0xff] %vm195_vm3, %v895_v49  ;;  %903 = vst.msk [vmem:[#allocation3 + $0x28] sm:$0xff] %vm195_vm3, %v895_v49 }
0x10d1   :  { %v905_v50 = vld [vmem:[#allocation4] sm:$0xff]  ;;  %v1143_v59 = vld [vmem:[#allocation3 + $0x28] sm:$0xff] }
0x10d2   :  { %2568 = vmatmul.mubr.msk.f32.vlgmr.msra.gmra.mxu0 %vm195_vm3, %v905_v50 }
0x10d3   :  { %2582 = vmatpush3.msra.mxu0 %v1149_v44  ;;  %2589 = vmatprep.mubr.msk.f32.mxu0 %vm195_vm3, %v1138_v52  ;;  %v991_v15 = vpop.permute.xlu1 %990  ;;  %v3235_v52 = vld [vmem:[%s3422_s5] ss:$0 sm:$0xff] }
0x10d4   :  { %2583 = vmatprep.subr.mxu0 %v1148_v51 }
0x10d5   :  { %2584 = vmatpush3.msra.mxu0 %v1148_v51 }
0x10d6   :  { %2585 = vmatprep.subr.mxu0 %v1147_v53 }
0x10d7   :  { %2586 = vmatpush3.msra.mxu0 %v1147_v53 }
0x10d8   :  { %2587 = vmatprep.subr.mxu0 %v1146_v54 }
0x10d9   :  { %2588 = vmatpush3.msra.mxu0 %v1146_v54 }
0x10da   :  { %2590 = vmatmul.mubr.msk.f32.vlgmr.msra.gmra.mxu0 %vm195_vm3, %v1139_v55  ;;  %2623 = vmatprep.subr.mxu0 %v2833_v0 }
0x10db   :  { %2592 = vmatprep.mubr.msk.f32.mxu0 %vm195_vm3, %v1140_v56  ;;  %2624 = vmatpush3.msra.mxu0 %v3176_v12 }
0x10dc   :  { %2625 = vmatprep.subr.mxu0 %v2833_v0 }
0x10dd   :  { %2626 = vmatpush3.msra.mxu0 %v3181_v40 }
0x10de   :  { %2593 = vmatmul.mubr.msk.f32.gmra.mxu0 %vm195_vm3, %v1141_v57  ;;  %2627 = vmatprep.subr.mxu0 %v2833_v0 }
0x10df   :  { %2595 = vmatprep.mubr.msk.f32.mxu0 %vm195_vm3, %v1142_v58  ;;  %2628 = vmatpush3.msra.mxu0 %v3189_v41 }
0x10e0   :  { %2629 = vmatprep.subr.mxu0 %v2833_v0 }
0x10e1   :  { %2630 = vmatpush3.msra.mxu0 %v3202_v42 }
0x10e2   :  { %2596 = vmatmul.mubr.msk.f32.gmra.mxu0 %vm195_vm3, %v1143_v59  ;;  %2645 = vmatprep.subr.mxu0 %v2833_v0 }
0x1192   :  { %v975_v61 = vpop.f32.mrf.mxu0 }
0x1193   :  { %v979_v62 = vadd.f32 %v975_v61, %v179_v60 }
0x1194   :  { %v2569_v63 = vpop.f32.mrf.mxu0 }
0x1195   :  { %v2343_v1 = vmul.f32 -1.442695, %v979_v62 }
0x1197   :  { %2753 = vpow2.f32 %v2343_v1 }
0x1198   :  { %2755 = vtanh.f32 %v979_v62 }
0x119a   :  { %v2591_v50 = vpop.f32.mrf.mxu0 }
0x119c   :  { %v1247_v51 = vpop.f32.mrf.mxu0 }
0x119d   :  { %v1248_v53 = vadd.f32 %v3235_v52, %v1247_v51 }
0x11a4   :  { %v2754_v3 = vpop.eup %2753 }
0x11a5   :  { %v985_v4 = vadd.f32 1.0, %v2754_v3  ;;  %v2756_v8 = vpop.eup %2755 }
0x11a7   :  { %2757 = vrcp.f32 %v985_v4 }
0x11b4   :  { %v2758_v9 = vpop.eup %2757 }
0x11b5   :  { %v988_v11 = vsel %vm2962_vm6, %v2756_v8, %v2758_v9 }
0x11b6   :  { %995 = vrot.lane.b32.xlu0 %v988_v11, %s2835_s2  ;;  %v993_v18 = vmul.f32 %v991_v15, %v988_v11 }
0x1228   :  { %v996_v16 = vpop.permute.xlu0 %995 }
0x1229   :  { %v998_v17 = vmul.f32 %v996_v16, %v988_v11 }
0x122b   :  { %1000 = vrot.lane.b32.xlu0 %v998_v17, %s2836_s23 }
0x129d   :  { %v1001_v19 = vpop.permute.xlu0 %1000 }
0x129e   :  { %v1003_v20 = vadd.f32 %v1001_v19, %v993_v18 }
0x12a0   :  { %2759 = vtanh.f32 %v1003_v20 }
0x12ad   :  { %v2760_v13 = vpop.eup %2759 }
0x12ae   :  { %1006 = vrot.lane.b32.xlu1 %v2760_v13, %s2835_s2  ;;  %v1253_v13 = vadd.f32 %v2591_v50, %v3235_v52 }
0x12b2   :  { %1016 = vrot.lane.b32.xlu1 %v1003_v20, %s2837_s24 }
0x1320   :  { %v1007_v22 = vpop.permute.xlu1 %1006 }
0x1321   :  { %v1009_v23 = vmul.f32 %v1007_v22, %v988_v11 }
0x1323   :  { %1011 = vrot.lane.b32.xlu0 %v1009_v23, %s2836_s23 }
0x1324   :  { %v1017_v24 = vpop.permute.xlu1 %1016 }
0x1325   :  { %1019 = vst.msk [vmem:[#allocation5] sm:$0xff] %vm195_vm3, %v1017_v24 }
0x132c   :  { %v1097_v25 = vld [vmem:[#allocation5] sm:$0xff] }
0x132d   :  { %1107 = vrot.lane.b32.xlu1 %v1097_v25, %s2836_s23 }
0x1395   :  { %v1012_v26 = vpop.permute.xlu0 %1011 }
0x1396   :  { %1014 = vst.msk [vmem:[#allocation4] sm:$0xff] %vm195_vm3, %v1012_v26  ;;  %1020 = vst.msk [vmem:[#allocation3 + $0x30] sm:$0xff] %vm195_vm3, %v1012_v26 }
0x139d   :  { %v1022_v27 = vld [vmem:[#allocation4] sm:$0xff]  ;;  %v1144_v28 = vld [vmem:[#allocation3 + $0x30] sm:$0xff] }
0x139e   :  { %2579 = vmatmul.mubr.msk.f32.vlgmr.msra.gmra.mxu1 %vm195_vm3, %v1022_v27  ;;  %2598 = vmatprep.mubr.msk.f32.mxu0 %vm195_vm3, %v1144_v28 }
0x139f   :  { %2609 = vmatprep.mubr.msk.f32.mxu1 %vm2834_vm2, %v2833_v0  ;;  %v1108_v10 = vpop.permute.xlu1 %1107  ;;  %2602 = vmatpush3.msra.mxu1 %v3176_v12 }
0x13a0   :  { %2603 = vmatprep.subr.mxu1 %v2833_v0 }
0x13a1   :  { %2604 = vmatpush3.msra.mxu1 %v3181_v40 }
0x13a2   :  { %2605 = vmatprep.subr.mxu1 %v2833_v0 }
0x13a3   :  { %2606 = vmatpush3.msra.mxu1 %v3189_v41 }
0x13a4   :  { %2607 = vmatprep.subr.mxu1 %v2833_v0 }
0x13a5   :  { %2608 = vmatpush3.msra.mxu1 %v3202_v42 }
0x13a6   :  { %2612 = vmatprep.subr.mxu1 %v2833_v0 }
0x145e   :  { %v1092_v30 = vpop.f32.mrf.mxu1 }
0x145f   :  { %v1096_v31 = vadd.f32 %v1092_v30, %v184_v29 }
0x1460   :  { %v2580_v2 = vpop.f32.mrf.mxu1 }
0x1461   :  { %v2345_v32 = vmul.f32 -1.442695, %v1096_v31 }
0x1463   :  { %2761 = vpow2.f32 %v2345_v32 }
0x1464   :  { %2763 = vtanh.f32 %v1096_v31 }
0x1470   :  { %v2762_v33 = vpop.eup %2761 }
0x1471   :  { %v1102_v34 = vadd.f32 1.0, %v2762_v33  ;;  %v2764_v35 = vpop.eup %2763 }
0x1473   :  { %2765 = vrcp.f32 %v1102_v34 }
0x1480   :  { %v2766_v36 = vpop.eup %2765 }
0x1481   :  { %v1105_v5 = vsel %vm2962_vm6, %v2764_v35, %v2766_v36 }
0x1482   :  { %1112 = vrot.lane.b32.xlu0 %v1105_v5, %s2835_s2  ;;  %v1110_v14 = vmul.f32 %v1108_v10, %v1105_v5 }
0x14f4   :  { %v1113_v37 = vpop.permute.xlu0 %1112 }
0x14f5   :  { %v1115_v6 = vmul.f32 %v1113_v37, %v1105_v5 }
0x14f7   :  { %1117 = vrot.lane.b32.xlu0 %v1115_v6, %s2836_s23 }
0x1569   :  { %v1118_v38 = vpop.permute.xlu0 %1117 }
0x156a   :  { %v1120_v7 = vadd.f32 %v1118_v38, %v1110_v14 }
0x156c   :  { %2767 = vtanh.f32 %v1120_v7 }
0x1579   :  { %v2768_v39 = vpop.eup %2767 }
0x157a   :  { %1123 = vrot.lane.b32.xlu1 %v2768_v39, %s2835_s2 }
0x157e   :  { %1133 = vrot.lane.b32.xlu1 %v1120_v7, %s2837_s24  ;;  %v2594_v7 = vpop.f32.mrf.mxu0 }
0x1580   :  { %v1257_v39 = vpop.f32.mrf.mxu0 }
0x15ec   :  { %v1124_v43 = vpop.permute.xlu1 %1123 }
0x15ed   :  { %v1126_v44 = vmul.f32 %v1124_v43, %v1105_v5  ;;  %v3281_v43 = vpop.f32.mrf.mxu0 }
0x15ef   :  { %1128 = vrot.lane.b32.xlu0 %v1126_v44, %s2836_s23  ;;  %v3283_v44 = vpop.f32.mrf.mxu0 }
0x15f0   :  { %v1134_v45 = vpop.permute.xlu1 %1133 }
0x15f1   :  { %1136 = vst.msk [vmem:[#allocation5] sm:$0xff] %vm195_vm3, %v1134_v45 }
0x15f2   :  { %1295 = vst.msk [vmem:[#allocation5] sm:$0xff] %vm195_vm3, %v2833_v0 }
0x15f9   :  { %v1376_v46 = vld [vmem:[#allocation5] sm:$0xff] }
0x15fa   :  { %1386 = vrot.lane.b32.xlu1 %v1376_v46, %s2836_s23 }
0x1661   :  { %v1129_v47 = vpop.permute.xlu0 %1128 }
0x1662   :  { %1131 = vst.msk [vmem:[#allocation4] sm:$0xff] %vm195_vm3, %v1129_v47  ;;  %1137 = vst.msk [vmem:[#allocation3 + $0x38] sm:$0xff] %vm195_vm3, %v1129_v47  ;;  %v1258_v47 = vadd.f32 %v3235_v52, %v1257_v39 }
0x1663   :  { %1294 = vst.msk [vmem:[#allocation4] sm:$0xff] %vm195_vm3, %v2833_v0 }
0x1669   :  { %v1145_v48 = vld [vmem:[#allocation3 + $0x38] sm:$0xff] }
0x166a   :  { %2599 = vmatmul.mubr.msk.f32.gmra.mxu0 %vm195_vm3, %v1145_v48  ;;  %v1301_v49 = vld [vmem:[#allocation4] sm:$0xff] }
0x166b   :  { %2610 = vmatmul.mubr.msk.f32.vlgmr.msra.gmra.mxu1 %vm195_vm3, %v1301_v49  ;;  %2631 = vmatprep.mubr.msk.f32.mxu0 %vm2834_vm2, %v2833_v0 }
0x166c   :  { %2613 = vmatpush3.msra.mxu1 %v3176_v12  ;;  %2620 = vmatprep.mubr.msk.f32.mxu1 %vm2834_vm2, %v2833_v0  ;;  %v1387_v3 = vpop.permute.xlu1 %1386 }
0x166d   :  { %2614 = vmatprep.subr.mxu1 %v2833_v0 }
0x166e   :  { %2615 = vmatpush3.msra.mxu1 %v3181_v40 }
0x166f   :  { %2616 = vmatprep.subr.mxu1 %v2833_v0 }
0x1670   :  { %2617 = vmatpush3.msra.mxu1 %v3189_v41 }
0x1671   :  { %2618 = vmatprep.subr.mxu1 %v2833_v0 }
0x1672   :  { %2619 = vmatpush3.msra.mxu1 %v3202_v42 }
0x1673   :  { %2634 = vmatprep.subr.mxu1 %v2833_v0 }
0x172a   :  { %v3285_v45 = vpop.f32.mrf.mxu0 }
0x172b   :  { %v1371_v54 = vpop.f32.mrf.mxu1 }
0x172c   :  { %v1375_v55 = vadd.f32 %v1371_v54, %v1248_v53  ;;  %v3287_v46 = vpop.f32.mrf.mxu0 }
0x172d   :  { %v2611_v56 = vpop.f32.mrf.mxu1 }
0x172e   :  { %v2356_v57 = vmul.f32 -1.442695, %v1375_v55 }
0x1730   :  { %2769 = vpow2.f32 %v2356_v57 }
0x1731   :  { %2771 = vtanh.f32 %v1375_v55 }
0x173d   :  { %v2770_v58 = vpop.eup %2769 }
0x173e   :  { %v1381_v59 = vadd.f32 1.0, %v2770_v58  ;;  %v2772_v60 = vpop.eup %2771 }
0x1740   :  { %2773 = vrcp.f32 %v1381_v59 }
0x174d   :  { %v2774_v61 = vpop.eup %2773 }
0x174e   :  { %v1384_v62 = vsel %vm2962_vm6, %v2772_v60, %v2774_v61 }
0x174f   :  { %1391 = vrot.lane.b32.xlu0 %v1384_v62, %s2835_s2  ;;  %v1389_v4 = vmul.f32 %v1387_v3, %v1384_v62 }
0x17c1   :  { %v1392_v63 = vpop.permute.xlu0 %1391 }
0x17c2   :  { %v1394_v1 = vmul.f32 %v1392_v63, %v1384_v62 }
0x17c4   :  { %1396 = vrot.lane.b32.xlu0 %v1394_v1, %s2836_s23 }
0x1836   :  { %v1397_v8 = vpop.permute.xlu0 %1396 }
0x1837   :  { %v1399_v9 = vadd.f32 %v1397_v8, %v1389_v4 }
0x1839   :  { %2775 = vtanh.f32 %v1399_v9 }
0x1846   :  { %v2776_v11 = vpop.eup %2775 }
0x1847   :  { %1402 = vrot.lane.b32.xlu1 %v2776_v11, %s2835_s2 }
0x184b   :  { %1412 = vrot.lane.b32.xlu1 %v1399_v9, %s2837_s24 }
0x18b9   :  { %v1403_v16 = vpop.permute.xlu1 %1402 }
0x18ba   :  { %v1405_v17 = vmul.f32 %v1403_v16, %v1384_v62 }
0x18bc   :  { %1407 = vrot.lane.b32.xlu0 %v1405_v17, %s2836_s23  ;;  %v1263_v17 = vadd.f32 %v2594_v7, %v3235_v52 }
0x18bd   :  { %v1413_v15 = vpop.permute.xlu1 %1412 }
0x18be   :  { %1415 = vst.msk [vmem:[#allocation5] sm:$0xff] %vm195_vm3, %v1413_v15 }
0x18c5   :  { %v1492_v18 = vld [vmem:[#allocation5] sm:$0xff] }
0x18c6   :  { %1502 = vrot.lane.b32.xlu1 %v1492_v18, %s2836_s23 }
0x192e   :  { %v1408_v19 = vpop.permute.xlu0 %1407 }
0x192f   :  { %1410 = vst.msk [vmem:[#allocation4] sm:$0xff] %vm195_vm3, %v1408_v19 }
0x1936   :  { %v1417_v20 = vld [vmem:[#allocation4] sm:$0xff] }
0x1937   :  { %2621 = vmatmul.mubr.msk.f32.vlgmr.msra.gmra.mxu1 %vm195_vm3, %v1417_v20 }
0x1938   :  { %2635 = vmatpush3.msra.mxu1 %v3176_v12  ;;  %2642 = vmatprep.mubr.msk.f32.mxu1 %vm2834_vm2, %v2833_v0  ;;  %v1503_v32 = vpop.permute.xlu1 %1502 }
0x1939   :  { %2636 = vmatprep.subr.mxu1 %v2833_v0 }
0x193a   :  { %2637 = vmatpush3.msra.mxu1 %v3181_v40 }
0x193b   :  { %2638 = vmatprep.subr.mxu1 %v2833_v0 }
0x193c   :  { %2639 = vmatpush3.msra.mxu1 %v3189_v41 }
0x193d   :  { %2640 = vmatprep.subr.mxu1 %v2833_v0 }
0x193e   :  { %2641 = vmatpush3.msra.mxu1 %v3202_v42 }
0x193f   :  { %2656 = vmatprep.subr.mxu1 %v2833_v0 }
0x19f7   :  { %v1487_v22 = vpop.f32.mrf.mxu1 }
0x19f8   :  { %v1491_v23 = vadd.f32 %v1487_v22, %v1253_v13 }
0x19f9   :  { %v2622_v24 = vpop.f32.mrf.mxu1 }
0x19fa   :  { %v2358_v25 = vmul.f32 -1.442695, %v1491_v23 }
0x19fc   :  { %2777 = vpow2.f32 %v2358_v25 }
0x19fd   :  { %2779 = vtanh.f32 %v1491_v23 }
0x1a09   :  { %v2778_v26 = vpop.eup %2777 }
0x1a0a   :  { %v1497_v27 = vadd.f32 1.0, %v2778_v26  ;;  %v2780_v28 = vpop.eup %2779 }
0x1a0c   :  { %2781 = vrcp.f32 %v1497_v27 }
0x1a19   :  { %v2782_v29 = vpop.eup %2781 }
0x1a1a   :  { %v1500_v30 = vsel %vm2962_vm6, %v2780_v28, %v2782_v29 }
0x1a1b   :  { %1507 = vrot.lane.b32.xlu0 %v1500_v30, %s2835_s2  ;;  %v1505_v33 = vmul.f32 %v1503_v32, %v1500_v30 }
0x1a8d   :  { %v1508_v31 = vpop.permute.xlu0 %1507 }
0x1a8e   :  { %v1510_v2 = vmul.f32 %v1508_v31, %v1500_v30 }
0x1a90   :  { %1512 = vrot.lane.b32.xlu0 %v1510_v2, %s2836_s23 }
0x1b02   :  { %v1513_v34 = vpop.permute.xlu0 %1512 }
0x1b03   :  { %v1515_v35 = vadd.f32 %v1513_v34, %v1505_v33 }
0x1b05   :  { %2783 = vtanh.f32 %v1515_v35 }
0x1b12   :  { %v2784_v36 = vpop.eup %2783 }
0x1b13   :  { %1518 = vrot.lane.b32.xlu1 %v2784_v36, %s2835_s2 }
0x1b17   :  { %1528 = vrot.lane.b32.xlu1 %v1515_v35, %s2837_s24 }
0x1b85   :  { %v1519_v5 = vpop.permute.xlu1 %1518 }
0x1b86   :  { %v1521_v37 = vmul.f32 %v1519_v5, %v1500_v30 }
0x1b88   :  { %1523 = vrot.lane.b32.xlu0 %v1521_v37, %s2836_s23  ;;  %v1268_v37 = vadd.f32 %v3235_v52, %v3283_v44 }
0x1b89   :  { %v1529_v6 = vpop.permute.xlu1 %1528 }
0x1b8a   :  { %1531 = vst.msk [vmem:[#allocation5] sm:$0xff] %vm195_vm3, %v1529_v6 }
0x1b91   :  { %v1608_v10 = vld [vmem:[#allocation5] sm:$0xff] }
0x1b92   :  { %1618 = vrot.lane.b32.xlu1 %v1608_v10, %s2836_s23 }
0x1bfa   :  { %v1524_v14 = vpop.permute.xlu0 %1523 }
0x1bfb   :  { %1526 = vst.msk [vmem:[#allocation4] sm:$0xff] %vm195_vm3, %v1524_v14 }
0x1c02   :  { %v1533_v38 = vld [vmem:[#allocation4] sm:$0xff] }
0x1c03   :  { %2632 = vmatmul.mubr.msk.f32.vlgmr.msra.gmra.mxu0 %vm195_vm3, %v1533_v38 }
0x1c04   :  { %2646 = vmatpush3.msra.mxu0 %v3176_v12  ;;  %2653 = vmatprep.mubr.msk.f32.mxu0 %vm2834_vm2, %v2833_v0  ;;  %v1619_v60 = vpop.permute.xlu1 %1618 }
0x1c05   :  { %2647 = vmatprep.subr.mxu0 %v2833_v0 }
0x1c06   :  { %2648 = vmatpush3.msra.mxu0 %v3181_v40 }
0x1c07   :  { %2649 = vmatprep.subr.mxu0 %v2833_v0 }
0x1c08   :  { %2650 = vmatpush3.msra.mxu0 %v3189_v41 }
0x1c09   :  { %2651 = vmatprep.subr.mxu0 %v2833_v0 }
0x1c0a   :  { %2652 = vmatpush3.msra.mxu0 %v3202_v42 }
0x1c0b   :  { %2667 = vmatprep.subr.mxu0 %v2833_v0 }
0x1cc3   :  { %v1603_v48 = vpop.f32.mrf.mxu0 }
0x1cc4   :  { %v1607_v49 = vadd.f32 %v1603_v48, %v1258_v47 }
0x1cc5   :  { %v2633_v50 = vpop.f32.mrf.mxu0 }
0x1cc6   :  { %v2360_v51 = vmul.f32 -1.442695, %v1607_v49 }
0x1cc8   :  { %2785 = vpow2.f32 %v2360_v51 }
0x1cc9   :  { %2787 = vtanh.f32 %v1607_v49 }
0x1cd5   :  { %v2786_v53 = vpop.eup %2785 }
0x1cd6   :  { %v1613_v54 = vadd.f32 1.0, %v2786_v53  ;;  %v2788_v55 = vpop.eup %2787 }
0x1cd8   :  { %2789 = vrcp.f32 %v1613_v54 }
0x1ce5   :  { %v2790_v56 = vpop.eup %2789 }
0x1ce6   :  { %v1616_v57 = vsel %vm2962_vm6, %v2788_v55, %v2790_v56 }
0x1ce7   :  { %1623 = vrot.lane.b32.xlu0 %v1616_v57, %s2835_s2  ;;  %v1621_v61 = vmul.f32 %v1619_v60, %v1616_v57 }
0x1d59   :  { %v1624_v58 = vpop.permute.xlu0 %1623 }
0x1d5a   :  { %v1626_v59 = vmul.f32 %v1624_v58, %v1616_v57 }
0x1d5c   :  { %1628 = vrot.lane.b32.xlu0 %v1626_v59, %s2836_s23 }
0x1dce   :  { %v1629_v62 = vpop.permute.xlu0 %1628 }
0x1dcf   :  { %v1631_v63 = vadd.f32 %v1629_v62, %v1621_v61 }
0x1dd1   :  { %2791 = vtanh.f32 %v1631_v63 }
0x1dde   :  { %v2792_v1 = vpop.eup %2791 }
0x1ddf   :  { %1634 = vrot.lane.b32.xlu1 %v2792_v1, %s2835_s2 }
0x1de3   :  { %1644 = vrot.lane.b32.xlu1 %v1631_v63, %s2837_s24  ;;  %v1273_v63 = vadd.f32 %v3281_v43, %v3235_v52 }
0x1e51   :  { %v1635_v3 = vpop.permute.xlu1 %1634 }
0x1e52   :  { %v1637_v4 = vmul.f32 %v1635_v3, %v1616_v57 }
0x1e54   :  { %1639 = vrot.lane.b32.xlu0 %v1637_v4, %s2836_s23 }
0x1e55   :  { %v1645_v8 = vpop.permute.xlu1 %1644 }
0x1e56   :  { %1647 = vst.msk [vmem:[#allocation5] sm:$0xff] %vm195_vm3, %v1645_v8 }
0x1e5d   :  { %v1724_v9 = vld [vmem:[#allocation5] sm:$0xff] }
0x1e5e   :  { %1734 = vrot.lane.b32.xlu1 %v1724_v9, %s2836_s23 }
0x1ec6   :  { %v1640_v11 = vpop.permute.xlu0 %1639 }
0x1ec7   :  { %1642 = vst.msk [vmem:[#allocation4] sm:$0xff] %vm195_vm3, %v1640_v11 }
0x1ece   :  { %v1649_v16 = vld [vmem:[#allocation4] sm:$0xff] }
0x1ecf   :  { %2643 = vmatmul.mubr.msk.f32.vlgmr.msra.gmra.mxu1 %vm195_vm3, %v1649_v16 }
0x1ed0   :  { %2657 = vmatpush3.msra.mxu1 %v3176_v12  ;;  %2664 = vmatprep.mubr.msk.f32.mxu1 %vm2834_vm2, %v2833_v0  ;;  %v1735_v28 = vpop.permute.xlu1 %1734 }
0x1ed1   :  { %2658 = vmatprep.subr.mxu1 %v2833_v0 }
0x1ed2   :  { %2659 = vmatpush3.msra.mxu1 %v3181_v40 }
0x1ed3   :  { %2660 = vmatprep.subr.mxu1 %v2833_v0 }
0x1ed4   :  { %2661 = vmatpush3.msra.mxu1 %v3189_v41 }
0x1ed5   :  { %2662 = vmatprep.subr.mxu1 %v2833_v0 }
0x1ed6   :  { %2663 = vmatpush3.msra.mxu1 %v3202_v42 }
0x1ed7   :  { %2678 = vmatprep.subr.mxu1 %v2833_v0 }
0x1f8f   :  { %v1719_v15 = vpop.f32.mrf.mxu1 }
0x1f90   :  { %v1723_v18 = vadd.f32 %v1719_v15, %v1263_v17 }
0x1f91   :  { %v2644_v19 = vpop.f32.mrf.mxu1 }
0x1f92   :  { %v2362_v20 = vmul.f32 -1.442695, %v1723_v18 }
0x1f94   :  { %2793 = vpow2.f32 %v2362_v20 }
0x1f95   :  { %2795 = vtanh.f32 %v1723_v18 }
0x1fa1   :  { %v2794_v13 = vpop.eup %2793 }
0x1fa2   :  { %v1729_v22 = vadd.f32 1.0, %v2794_v13  ;;  %v2796_v23 = vpop.eup %2795 }
0x1fa4   :  { %2797 = vrcp.f32 %v1729_v22 }
0x1fb1   :  { %v2798_v24 = vpop.eup %2797 }
0x1fb2   :  { %v1732_v25 = vsel %vm2962_vm6, %v2796_v23, %v2798_v24 }
0x1fb3   :  { %1739 = vrot.lane.b32.xlu0 %v1732_v25, %s2835_s2  ;;  %v1737_v29 = vmul.f32 %v1735_v28, %v1732_v25 }
0x2025   :  { %v1740_v26 = vpop.permute.xlu0 %1739 }
0x2026   :  { %v1742_v27 = vmul.f32 %v1740_v26, %v1732_v25  ;;  %v1278_v26 = vadd.f32 %v3235_v52, %v3287_v46 }
0x2028   :  { %1744 = vrot.lane.b32.xlu0 %v1742_v27, %s2836_s23 }
0x209a   :  { %v1745_v30 = vpop.permute.xlu0 %1744 }
0x209b   :  { %v1747_v31 = vadd.f32 %v1745_v30, %v1737_v29 }
0x209d   :  { %2799 = vtanh.f32 %v1747_v31 }
0x20aa   :  { %v2800_v2 = vpop.eup %2799 }
0x20ab   :  { %1750 = vrot.lane.b32.xlu1 %v2800_v2, %s2835_s2 }
0x20af   :  { %1760 = vrot.lane.b32.xlu1 %v1747_v31, %s2837_s24 }
0x211d   :  { %v1751_v32 = vpop.permute.xlu1 %1750 }
0x211e   :  { %v1753_v33 = vmul.f32 %v1751_v32, %v1732_v25 }
0x2120   :  { %1755 = vrot.lane.b32.xlu0 %v1753_v33, %s2836_s23 }
0x2121   :  { %v1761_v34 = vpop.permute.xlu1 %1760 }
0x2122   :  { %1763 = vst.msk [vmem:[#allocation5] sm:$0xff] %vm195_vm3, %v1761_v34 }
0x2129   :  { %v1840_v35 = vld [vmem:[#allocation5] sm:$0xff] }
0x212a   :  { %1850 = vrot.lane.b32.xlu1 %v1840_v35, %s2836_s23 }
0x2192   :  { %v1756_v36 = vpop.permute.xlu0 %1755 }
0x2193   :  { %1758 = vst.msk [vmem:[#allocation4] sm:$0xff] %vm195_vm3, %v1756_v36 }
0x219a   :  { %v1765_v5 = vld [vmem:[#allocation4] sm:$0xff] }
0x219b   :  { %2654 = vmatmul.mubr.msk.f32.vlgmr.msra.gmra.mxu0 %vm195_vm3, %v1765_v5 }
0x219c   :  { %2668 = vmatpush3.msra.mxu0 %v3176_v12  ;;  %2675 = vmatprep.mubr.msk.f32.mxu0 %vm2834_vm2, %v2833_v0  ;;  %v1851_v44 = vpop.permute.xlu1 %1850 }
0x219d   :  { %2669 = vmatprep.subr.mxu0 %v2833_v0 }
0x219e   :  { %2670 = vmatpush3.msra.mxu0 %v3181_v40 }
0x219f   :  { %2671 = vmatprep.subr.mxu0 %v2833_v0 }
0x21a0   :  { %2672 = vmatpush3.msra.mxu0 %v3189_v41 }
0x21a1   :  { %2673 = vmatprep.subr.mxu0 %v2833_v0 }
0x21a2   :  { %2674 = vmatpush3.msra.mxu0 %v3202_v42 }
0x21a3   :  { %2689 = vmatprep.subr.mxu0 %v2833_v0 }
0x225b   :  { %v1835_v6 = vpop.f32.mrf.mxu0 }
0x225c   :  { %v1839_v10 = vadd.f32 %v1835_v6, %v1268_v37 }
0x225d   :  { %v2655_v14 = vpop.f32.mrf.mxu0 }
0x225e   :  { %v2364_v38 = vmul.f32 -1.442695, %v1839_v10 }
0x2260   :  { %2801 = vpow2.f32 %v2364_v38 }
0x2261   :  { %2803 = vtanh.f32 %v1839_v10 }
0x226d   :  { %v2802_v7 = vpop.eup %2801 }
0x226e   :  { %v1845_v39 = vadd.f32 1.0, %v2802_v7  ;;  %v2804_v47 = vpop.eup %2803 }
0x2270   :  { %2805 = vrcp.f32 %v1845_v39 }
0x227d   :  { %v2806_v48 = vpop.eup %2805 }
0x227e   :  { %v1848_v49 = vsel %vm2962_vm6, %v2804_v47, %v2806_v48 }
0x227f   :  { %1855 = vrot.lane.b32.xlu0 %v1848_v49, %s2835_s2  ;;  %v1853_v53 = vmul.f32 %v1851_v44, %v1848_v49 }
0x22f1   :  { %v1856_v50 = vpop.permute.xlu0 %1855 }
0x22f2   :  { %v1858_v51 = vmul.f32 %v1856_v50, %v1848_v49 }
0x22f4   :  { %1860 = vrot.lane.b32.xlu0 %v1858_v51, %s2836_s23 }
0x2366   :  { %v1861_v54 = vpop.permute.xlu0 %1860 }
0x2367   :  { %v1863_v55 = vadd.f32 %v1861_v54, %v1853_v53 }
0x2369   :  { %2807 = vtanh.f32 %v1863_v55 }
0x2376   :  { %v2808_v56 = vpop.eup %2807 }
0x2377   :  { %1866 = vrot.lane.b32.xlu1 %v2808_v56, %s2835_s2 }
0x237b   :  { %1876 = vrot.lane.b32.xlu1 %v1863_v55, %s2837_s24 }
0x23e9   :  { %v1867_v57 = vpop.permute.xlu1 %1866 }
0x23ea   :  { %v1869_v58 = vmul.f32 %v1867_v57, %v1848_v49  ;;  %v1283_v49 = vadd.f32 %v3285_v45, %v3235_v52 }
0x23ec   :  { %1871 = vrot.lane.b32.xlu0 %v1869_v58, %s2836_s23 }
0x23ed   :  { %v1877_v59 = vpop.permute.xlu1 %1876 }
0x23ee   :  { %1879 = vst.msk [vmem:[#allocation5] sm:$0xff] %vm195_vm3, %v1877_v59 }
0x23f5   :  { %v1956_v60 = vld [vmem:[#allocation5] sm:$0xff] }
0x23f6   :  { %1966 = vrot.lane.b32.xlu1 %v1956_v60, %s2836_s23 }
0x245e   :  { %v1872_v61 = vpop.permute.xlu0 %1871 }
0x245f   :  { %1874 = vst.msk [vmem:[#allocation4] sm:$0xff] %vm195_vm3, %v1872_v61 }
0x2466   :  { %v1881_v62 = vld [vmem:[#allocation4] sm:$0xff] }
0x2467   :  { %2665 = vmatmul.mubr.msk.f32.vlgmr.msra.gmra.mxu1 %vm195_vm3, %v1881_v62 }
0x2468   :  { %2679 = vmatpush3.msra.mxu1 %v3176_v12  ;;  %2686 = vmatprep.mubr.msk.f32.mxu1 %vm2834_vm2, %v2833_v0  ;;  %v1967_v43 = vpop.permute.xlu1 %1966 }
0x2469   :  { %2680 = vmatprep.subr.mxu1 %v2833_v0 }
0x246a   :  { %2681 = vmatpush3.msra.mxu1 %v3181_v40 }
0x246b   :  { %2682 = vmatprep.subr.mxu1 %v2833_v0 }
0x246c   :  { %2683 = vmatpush3.msra.mxu1 %v3189_v41 }
0x246d   :  { %2684 = vmatprep.subr.mxu1 %v2833_v0 }
0x246e   :  { %2685 = vmatpush3.msra.mxu1 %v3202_v42 }
0x2527   :  { %v1951_v1 = vpop.f32.mrf.mxu1 }
0x2528   :  { %v1955_v12 = vadd.f32 %v1951_v1, %v1273_v63  ;;  %v2232_v1 = vld [vmem:[%s3423_s7 + $0x10] sm:$0xff] }
0x2529   :  { %v2666_v3 = vpop.f32.mrf.mxu1 }
0x252a   :  { %v2366_v4 = vmul.f32 -1.442695, %v1955_v12  ;;  %v2230_v3 = vld [vmem:[%s3423_s7] sm:$0xff] }
0x252c   :  { %2809 = vpow2.f32 %v2366_v4 }
0x252d   :  { %2811 = vtanh.f32 %v1955_v12  ;;  %v2231_v12 = vld [vmem:[%s3423_s7 + $0x8] sm:$0xff] }
0x2539   :  { %v2810_v8 = vpop.eup %2809 }
0x253a   :  { %v1961_v9 = vadd.f32 1.0, %v2810_v8  ;;  %v2812_v40 = vpop.eup %2811 }
0x253c   :  { %2813 = vrcp.f32 %v1961_v9 }
0x2549   :  { %v2814_v11 = vpop.eup %2813 }
0x254a   :  { %v1964_v41 = vsel %vm2962_vm6, %v2812_v40, %v2814_v11 }
0x254b   :  { %1971 = vrot.lane.b32.xlu0 %v1964_v41, %s2835_s2  ;;  %v1969_v17 = vmul.f32 %v1967_v43, %v1964_v41 }
0x25bd   :  { %v1972_v42 = vpop.permute.xlu0 %1971 }
0x25be   :  { %v1974_v16 = vmul.f32 %v1972_v42, %v1964_v41  ;;  %v2371_v42 = vld [vmem:[%s3424_s8] ss:$0 sm:$0xff] }
0x25c0   :  { %1976 = vrot.lane.b32.xlu0 %v1974_v16, %s2836_s23 }
0x2632   :  { %v1977_v15 = vpop.permute.xlu0 %1976 }
0x2633   :  { %v1979_v18 = vadd.f32 %v1977_v15, %v1969_v17 }
0x2635   :  { %2815 = vtanh.f32 %v1979_v18 }
0x2642   :  { %v2816_v19 = vpop.eup %2815 }
0x2643   :  { %1982 = vrot.lane.b32.xlu1 %v2816_v19, %s2835_s2 }
0x2647   :  { %1992 = vrot.lane.b32.xlu1 %v1979_v18, %s2837_s24 }
0x26b5   :  { %v1983_v20 = vpop.permute.xlu1 %1982 }
0x26b6   :  { %v1985_v13 = vmul.f32 %v1983_v20, %v1964_v41 }
0x26b8   :  { %1987 = vrot.lane.b32.xlu0 %v1985_v13, %s2836_s23 }
0x26b9   :  { %v1993_v22 = vpop.permute.xlu1 %1992 }
0x26ba   :  { %1995 = vst.msk [vmem:[#allocation5] sm:$0xff] %vm195_vm3, %v1993_v22 }
0x26c1   :  { %v2072_v23 = vld [vmem:[#allocation5] sm:$0xff] }
0x26c2   :  { %2082 = vrot.lane.b32.xlu1 %v2072_v23, %s2836_s23 }
0x272a   :  { %v1988_v24 = vpop.permute.xlu0 %1987 }
0x272b   :  { %1990 = vst.msk [vmem:[#allocation4] sm:$0xff] %vm195_vm3, %v1988_v24 }
0x2732   :  { %v1997_v25 = vld [vmem:[#allocation4] sm:$0xff] }
0x2733   :  { %2676 = vmatmul.mubr.msk.f32.vlgmr.msra.gmra.mxu0 %vm195_vm3, %v1997_v25 }
0x2734   :  { %2697 = vmatprep.mubr.msk.f32.mxu0 %vm2834_vm2, %v2833_v0  ;;  %v2083_v46 = vpop.permute.xlu1 %2082  ;;  %2690 = vmatpush3.msra.mxu0 %v2233_v21 }
0x2735   :  { %2691 = vmatprep.subr.mxu0 %v2833_v0 }
0x2736   :  { %2692 = vmatpush3.msra.mxu0 %v2232_v1 }
0x2737   :  { %2693 = vmatprep.subr.mxu0 %v2833_v0 }
0x2738   :  { %2694 = vmatpush3.msra.mxu0 %v2231_v12 }
0x2739   :  { %2695 = vmatprep.subr.mxu0 %v2833_v0 }
0x273a   :  { %2696 = vmatpush3.msra.mxu0 %v2230_v3 }
0x27f3   :  { %v2067_v27 = vpop.f32.mrf.mxu0 }
0x27f4   :  { %v2071_v28 = vadd.f32 %v2067_v27, %v1278_v26 }
0x27f5   :  { %v2677_v29 = vpop.f32.mrf.mxu0 }
0x27f6   :  { %v2368_v30 = vmul.f32 -1.442695, %v2071_v28 }
0x27f8   :  { %2817 = vpow2.f32 %v2368_v30 }
0x27f9   :  { %2819 = vtanh.f32 %v2071_v28 }
0x2805   :  { %v2818_v31 = vpop.eup %2817 }
0x2806   :  { %v2077_v2 = vadd.f32 1.0, %v2818_v31  ;;  %v2820_v32 = vpop.eup %2819 }
0x2808   :  { %2821 = vrcp.f32 %v2077_v2 }
0x2815   :  { %v2822_v33 = vpop.eup %2821 }
0x2816   :  { %v2080_v34 = vsel %vm2962_vm6, %v2820_v32, %v2822_v33 }
0x2817   :  { %2087 = vrot.lane.b32.xlu0 %v2080_v34, %s2835_s2  ;;  %v2085_v5 = vmul.f32 %v2083_v46, %v2080_v34 }
0x2889   :  { %v2088_v35 = vpop.permute.xlu0 %2087 }
0x288a   :  { %v2090_v36 = vmul.f32 %v2088_v35, %v2080_v34 }
0x288c   :  { %2092 = vrot.lane.b32.xlu0 %v2090_v36, %s2836_s23 }
0x28fe   :  { %v2093_v37 = vpop.permute.xlu0 %2092 }
0x28ff   :  { %v2095_v6 = vadd.f32 %v2093_v37, %v2085_v5 }
0x2901   :  { %2823 = vtanh.f32 %v2095_v6 }
0x290e   :  { %v2824_v10 = vpop.eup %2823 }
0x290f   :  { %2098 = vrot.lane.b32.xlu1 %v2824_v10, %s2835_s2 }
0x2913   :  { %2108 = vrot.lane.b32.xlu1 %v2095_v6, %s2837_s24 }
0x2981   :  { %v2099_v14 = vpop.permute.xlu1 %2098 }
0x2982   :  { %v2101_v38 = vmul.f32 %v2099_v14, %v2080_v34 }
0x2984   :  { %2103 = vrot.lane.b32.xlu0 %v2101_v38, %s2836_s23 }
0x2985   :  { %v2109_v7 = vpop.permute.xlu1 %2108 }
0x2986   :  { %2111 = vst.msk [vmem:[#allocation5] sm:$0xff] %vm195_vm3, %v2109_v7 }
0x298d   :  { %v2188_v39 = vld [vmem:[#allocation5] sm:$0xff] }
0x298e   :  { %2198 = vrot.lane.b32.xlu1 %v2188_v39, %s2836_s23 }
0x29f6   :  { %v2104_v47 = vpop.permute.xlu0 %2103 }
0x29f7   :  { %2106 = vst.msk [vmem:[#allocation4] sm:$0xff] %vm195_vm3, %v2104_v47 }
0x29fe   :  { %v2113_v48 = vld [vmem:[#allocation4] sm:$0xff] }
0x29ff   :  { %2687 = vmatmul.mubr.msk.f32.vlgmr.msra.gmra.mxu1 %vm195_vm3, %v2113_v48 }
0x2a00   :  { %v2199_v52 = vpop.permute.xlu1 %2198 }
0x2abf   :  { %v2183_v50 = vpop.f32.mrf.mxu1 }
0x2ac0   :  { %v2187_v51 = vadd.f32 %v2183_v50, %v1283_v49 }
0x2ac1   :  { %v2688_v44 = vpop.f32.mrf.mxu1 }
0x2ac2   :  { %v2370_v53 = vmul.f32 -1.442695, %v2187_v51 }
0x2ac4   :  { %2825 = vpow2.f32 %v2370_v53 }
0x2ac5   :  { %2827 = vtanh.f32 %v2187_v51 }
0x2ad1   :  { %v2826_v54 = vpop.eup %2825 }
0x2ad2   :  { %v2193_v55 = vadd.f32 1.0, %v2826_v54  ;;  %v2828_v56 = vpop.eup %2827 }
0x2ad4   :  { %2829 = vrcp.f32 %v2193_v55 }
0x2ae1   :  { %v2830_v57 = vpop.eup %2829 }
0x2ae2   :  { %v2196_v58 = vsel %vm2962_vm6, %v2828_v56, %v2830_v57 }
0x2ae3   :  { %2203 = vrot.lane.b32.xlu0 %v2196_v58, %s2835_s2  ;;  %v2201_v45 = vmul.f32 %v2199_v52, %v2196_v58 }
0x2b55   :  { %v2204_v59 = vpop.permute.xlu0 %2203 }
0x2b56   :  { %v2206_v60 = vmul.f32 %v2204_v59, %v2196_v58 }
0x2b58   :  { %2208 = vrot.lane.b32.xlu0 %v2206_v60, %s2836_s23 }
0x2bca   :  { %v2209_v61 = vpop.permute.xlu0 %2208 }
0x2bcb   :  { %v2211_v62 = vadd.f32 %v2209_v61, %v2201_v45 }
0x2bcd   :  { %2831 = vtanh.f32 %v2211_v62 }
0x2bda   :  { %v2832_v63 = vpop.eup %2831 }
0x2bdb   :  { %2214 = vrot.lane.b32.xlu1 %v2832_v63, %s2835_s2 }
0x2bdf   :  { %2224 = vrot.lane.b32.xlu1 %v2211_v62, %s2837_s24 }
0x2c4d   :  { %v2215_v4 = vpop.permute.xlu1 %2214 }
0x2c4e   :  { %v2217_v8 = vmul.f32 %v2215_v4, %v2196_v58 }
0x2c50   :  { %2219 = vrot.lane.b32.xlu0 %v2217_v8, %s2836_s23 }
0x2c51   :  { %v2225_v9 = vpop.permute.xlu1 %2224 }
0x2c52   :  { %2227 = vst.msk [vmem:[#allocation5] sm:$0xff] %vm195_vm3, %v2225_v9 }
0x2cc2   :  { %v2220_v40 = vpop.permute.xlu0 %2219 }
0x2cc3   :  { %2222 = vst.msk [vmem:[#allocation4] sm:$0xff] %vm195_vm3, %v2220_v40 }
0x2cca   :  { %v2228_v11 = vld [vmem:[#allocation4] sm:$0xff] }
0x2ccb   :  { %v2229_v41 = vmax.f32 %v2228_v11, 0.0 }
0x2ccd   :  { %2698 = vmatmul.mubr.msk.f32.vlgmr.msra.gmra.mxu0 %vm195_vm3, %v2229_v41 }
0x2d8d   :  { %v2310_v0 = vpop.f32.mrf.mxu0 }
0x2d8e   :  { %v2311_v16 = vadd.f32 %v2371_v42, %v2310_v0 }
0x2d8f   :  { %v2699_v43 = vpop.f32.mrf.mxu0 }
0x2d90   :  { %2315 = vst.msk [vmem:[%s3425_s9] sm:$0xff] %vm2314_vm7, %v2311_v16 }

</bundles_post_ra>
